<compile_context>
chip_gen: v5e
topology: v5e:2x2
jax: 0.10.0
libtpu: 0.0.40
codegen_flags: <defaults>
</compile_context>

<pallas_src>
import functools

import jax
import jax.numpy as jnp
from jax.experimental import pallas as pl
from jax.experimental.pallas import tpu as pltpu


# -----------------------------------------------------------------------------
# Fused Block kernel
# -----------------------------------------------------------------------------

def _block_kernel(*refs, H, W, Cin, Pp, Cout, Ho, Wo, stride, shortcut, NB,
                  dw_dtype):
    """NB images: expand(1x1) -> depthwise(3x3) -> project(1x1) [+ residual]."""
    if shortcut == "conv":
        (x_ref, w1_ref, b1_ref, w2_ref, b2_ref, w3_ref, b3_ref, ws_ref,
         o_ref, hs_ref) = refs
    else:
        (x_ref, w1_ref, b1_ref, w2_ref, b2_ref, w3_ref, b3_ref,
         o_ref, hs_ref) = refs
        ws_ref = None

    S = H + 2  # rows per W-shifted copy inside the scratch

    # ---- halo-only scratch init (every grid step; each core owns its scratch)
    zrow = jnp.zeros((1, W, Pp), dw_dtype)
    for c in range(3):
        hs_ref[c * S:c * S + 1, :, :] = zrow            # top halo row
        hs_ref[c * S + H + 1:c * S + H + 2, :, :] = zrow  # bottom halo row

    # ---- load small operands once per grid step ------------------------------
    w1 = w1_ref[...]
    b1 = b1_ref[...]
    w2 = w2_ref[...]          # (9, 1, Pp) f32, BN folded
    b2 = b2_ref[...]
    w3 = w3_ref[...]
    b3 = b3_ref[...]          # (1, Cout); for conv shortcut this is b3 + bs
    ws = ws_ref[...] if shortcut == "conv" else None

    for b in range(NB):
        xm = x_ref[b].reshape(H * W, Cin)               # f32 (kept for residual)
        x_bf = xm.astype(jnp.bfloat16)

        # ---- expand: 1x1 conv (BN folded) + bias + ReLU  (MXU) ---------------
        h = jnp.dot(x_bf, w1, preferred_element_type=jnp.float32)
        h = jnp.maximum(h + b1, 0.0)                    # (H*W, Pp) f32
        hf = h.reshape(H, W, Pp)

        # ---- build the 3 W-shifted copies ONCE, in-register ------------------
        # (left / center / right neighbor along W, zero-filled at the border)
        zcol = jnp.zeros((H, 1, Pp), jnp.float32)
        hC = hf.astype(dw_dtype)
        hL = jnp.concatenate([zcol, hf[:, :W - 1, :]], axis=1).astype(dw_dtype)
        hR = jnp.concatenate([hf[:, 1:, :], zcol], axis=1).astype(dw_dtype)

        # aligned, full-row interior stores (rows 1..H of each copy)
        hs_ref[0 * S + 1:0 * S + 1 + H, :, :] = hL      # taps kw = 0
        hs_ref[1 * S + 1:1 * S + 1 + H, :, :] = hC      # taps kw = 1
        hs_ref[2 * S + 1:2 * S + 1 + H, :, :] = hR      # taps kw = 2

        # ---- 3x3 depthwise conv (BN folded) + bias + ReLU  (VPU, f32 acc) ----
        acc = jnp.zeros((Ho, Wo, Pp), jnp.float32)
        for kh in range(3):
            for kw in range(3):
                base = kw * S
                if stride == 1:
                    tap = hs_ref[base + kh:base + kh + Ho, :, :]
                else:
                    tap = hs_ref[pl.ds(base + kh, Ho, stride=stride),
                                 pl.ds(0, Wo, stride=stride), :]
                acc = acc + tap.astype(jnp.float32) * w2[kh * 3 + kw]
        g = jnp.maximum(acc + b2, 0.0)                  # (Ho, Wo, Pp) f32
        g_bf = g.reshape(Ho * Wo, Pp).astype(jnp.bfloat16)

        # ---- project: 1x1 conv (BN folded) + bias, no ReLU  (MXU) ------------
        out = jnp.dot(g_bf, w3, preferred_element_type=jnp.float32)

        # ---- shortcut / residual (added after the projection epilogue) ------
        if shortcut == "identity":                      # stride == 1, Cin == Cout
            out = out + b3 + xm
        elif shortcut == "conv":                        # stride == 1, Cin != Cout
            out = out + jnp.dot(x_bf, ws, preferred_element_type=jnp.float32) + b3
        else:                                           # stride == 2
            out = out + b3

        o_ref[b:b + 1] = out.reshape(1, Ho, Wo, Cout)


# -----------------------------------------------------------------------------
# Wrapper: generation-aware config + pallas_call
# -----------------------------------------------------------------------------

def _device_config():
    kind = jax.devices()[0].device_kind.lower()
    # v2-v5 VPUs have no bf16 arithmetic path -> stage depthwise in f32 there.
    old_vpu = any(t in kind for t in ("v2", "v3", "v4", "v5"))
    dw_dtype = jnp.float32 if old_vpu else jnp.bfloat16
    # v5e / v6e are single-TensorCore: collapse the batch into one grid step
    # to amortize per-step overhead.  v7x / megacore chips keep grid=(N,).
    single_tc = any(t in kind for t in ("v5e", "v5 lite", "v5lite",
                                        "v6e", "v6 lite", "v6lite"))
    return dw_dtype, single_tc


@functools.partial(jax.jit,
                   static_argnames=("stride", "shortcut", "nb", "dw_dtype"))
def _block_forward_impl(x_nchw, params, *, stride, shortcut, nb, dw_dtype):
    x = jnp.transpose(x_nchw, (0, 2, 3, 1)).astype(jnp.float32)  # NCHW -> NHWC
    N, H, W, Cin = x.shape
    Pp = params["w1"].shape[1]
    Cout = params["w3"].shape[1]
    Ho = (H - 1) // stride + 1
    Wo = (W - 1) // stride + 1
    assert N % nb == 0

    kernel = functools.partial(
        _block_kernel, H=H, W=W, Cin=Cin, Pp=Pp, Cout=Cout,
        Ho=Ho, Wo=Wo, stride=stride, shortcut=shortcut, NB=nb,
        dw_dtype=dw_dtype)

    in_specs = [
        pl.BlockSpec((nb, H, W, Cin), lambda n: (n, 0, 0, 0)),
        pl.BlockSpec((Cin, Pp), lambda n: (0, 0)),
        pl.BlockSpec((1, Pp), lambda n: (0, 0)),
        pl.BlockSpec((9, 1, Pp), lambda n: (0, 0, 0)),
        pl.BlockSpec((1, Pp), lambda n: (0, 0)),
        pl.BlockSpec((Pp, Cout), lambda n: (0, 0)),
        pl.BlockSpec((1, Cout), lambda n: (0, 0)),
    ]
    args = [x, params["w1"], params["b1"], params["w2"], params["b2"],
            params["w3"], params["b3"]]
    if shortcut == "conv":
        in_specs.append(pl.BlockSpec((Cin, Cout), lambda n: (0, 0)))
        args.append(params["ws"])

    out = pl.pallas_call(
        kernel,
        out_shape=jax.ShapeDtypeStruct((N, Ho, Wo, Cout), jnp.float32),
        grid=(N // nb,),
        in_specs=in_specs,
        out_specs=pl.BlockSpec((nb, Ho, Wo, Cout), lambda n: (n, 0, 0, 0)),
        scratch_shapes=[pltpu.VMEM((3 * (H + 2), W, Pp), dw_dtype)],
        compiler_params=pltpu.CompilerParams(
            dimension_semantics=("parallel",)),
    )(*args)
    return jnp.transpose(out, (0, 3, 1, 2))                      # NHWC -> NCHW


def block_forward(x_nchw, params, *, stride, shortcut):
    dw_dtype, single_tc = _device_config()
    nb = x_nchw.shape[0] if single_tc else 1
    return _block_forward_impl(x_nchw, params, stride=stride,
                               shortcut=shortcut, nb=nb, dw_dtype=dw_dtype)


# -----------------------------------------------------------------------------
# Parameter construction (deterministic, synthetic) with BN folding + padding
# -----------------------------------------------------------------------------

def _bn_fold(key, c, eps=1e-5):
    # BatchNorm folded from running stats (eval mode).
    k1, k2, k3, k4 = jax.random.split(key, 4)
    gamma = jax.random.uniform(k1, (c,), jnp.float32, 0.5, 1.5)
    beta = jax.random.normal(k2, (c,), jnp.float32) * 0.1
    mean = jax.random.normal(k3, (c,), jnp.float32) * 0.1
    var = jax.random.uniform(k4, (c,), jnp.float32, 0.5, 1.5)
    scale = gamma / jnp.sqrt(var + eps)
    bias = beta - mean * scale
    return scale, bias


def make_block_params(key, in_planes, out_planes, expansion, stride):
    P = expansion * in_planes
    Pp = ((P + 127) // 128) * 128            # lane-dense expanded width
    pad_c = Pp - P
    ks = jax.random.split(key, 8)
    w1 = jax.random.normal(ks[0], (in_planes, P), jnp.float32) * (2.0 / in_planes) ** 0.5
    w2 = jax.random.normal(ks[1], (3, 3, P), jnp.float32) * (2.0 / 9.0) ** 0.5
    w3 = jax.random.normal(ks[2], (P, out_planes), jnp.float32) * (2.0 / P) ** 0.5
    s1, b1 = _bn_fold(ks[3], P)
    s2, b2 = _bn_fold(ks[4], P)
    s3, b3 = _bn_fold(ks[5], out_planes)

    # BN scale folded into output-channel columns; extra channels are zero so
    # they contribute nothing (relu(0)=0 and zero rows of w3).
    w1p = jnp.pad(w1 * s1[None, :], ((0, 0), (0, pad_c)))
    b1p = jnp.pad(b1, (0, pad_c))
    w2p = jnp.pad((w2 * s2[None, None, :]).reshape(9, P), ((0, 0), (0, pad_c)))
    b2p = jnp.pad(b2, (0, pad_c))
    w3p = jnp.pad(w3 * s3[None, :], ((0, pad_c), (0, 0)))

    params = {
        "w1": w1p.astype(jnp.bfloat16),
        "b1": b1p.reshape(1, Pp),
        "w2": w2p.reshape(9, 1, Pp).astype(jnp.float32),
        "b2": b2p.reshape(1, Pp),
        "w3": w3p.astype(jnp.bfloat16),
        "b3": b3.reshape(1, out_planes),
    }
    if stride == 1 and in_planes != out_planes:
        ws = jax.random.normal(ks[6], (in_planes, out_planes), jnp.float32) * (2.0 / in_planes) ** 0.5
        ss, bs = _bn_fold(ks[7], out_planes)
        params["ws"] = (ws * ss[None, :]).astype(jnp.bfloat16)
        params["b3"] = (b3 + bs).reshape(1, out_planes)   # pre-summed epilogue bias
        shortcut = "conv"
    elif stride == 1:
        shortcut = "identity"
    else:
        shortcut = "none"
    return params, shortcut


# -----------------------------------------------------------------------------
# Pure-JAX reference (same folded-BN / padding / dtype numerics)
# -----------------------------------------------------------------------------

def block_reference(x_nchw, params, *, stride, shortcut, dw_dtype):
    x = jnp.transpose(x_nchw, (0, 2, 3, 1)).astype(jnp.float32)
    N, H, W, Cin = x.shape
    Pp = params["w1"].shape[1]
    Cout = params["w3"].shape[1]
    Ho = (H - 1) // stride + 1
    Wo = (W - 1) // stride + 1

    xm = x.reshape(N * H * W, Cin)
    h = jnp.dot(xm.astype(jnp.bfloat16), params["w1"],
                preferred_element_type=jnp.float32)
    h = jnp.maximum(h + params["b1"], 0.0)
    h = h.astype(dw_dtype).astype(jnp.float32).reshape(N, H, W, Pp)

    hp = jnp.pad(h, ((0, 0), (1, 1), (1, 1), (0, 0)))
    w2 = params["w2"].reshape(9, Pp)
    acc = jnp.zeros((N, Ho, Wo, Pp), jnp.float32)
    for kh in range(3):
        for kw in range(3):
            tap = hp[:, kh:kh + stride * (Ho - 1) + 1:stride,
                     kw:kw + stride * (Wo - 1) + 1:stride, :]
            acc = acc + tap * w2[kh * 3 + kw]
    g = jnp.maximum(acc + params["b2"].reshape(1, 1, 1, Pp), 0.0)

    out = jnp.dot(g.reshape(N * Ho * Wo, Pp).astype(jnp.bfloat16), params["w3"],
                  preferred_element_type=jnp.float32) + params["b3"]
    out = out.reshape(N, Ho, Wo, Cout)

    if shortcut == "identity":
        out = out + x
    elif shortcut == "conv":
        sc = jnp.dot(xm.astype(jnp.bfloat16), params["ws"],
                     preferred_element_type=jnp.float32)
        out = out + sc.reshape(N, H, W, Cout)
    return jnp.transpose(out, (0, 3, 1, 2))


# -----------------------------------------------------------------------------
# Harness
# -----------------------------------------------------------------------------

if __name__ == "__main__":
    key = jax.random.PRNGKey(0)
    kp, kx = jax.random.split(key)
    N, Cin, H, W = 2, 16, 16, 16
    x = jax.random.normal(kx, (N, Cin, H, W), jnp.float32)   # NCHW like PyTorch

    dw_dtype, _ = _device_config()

    # (in_planes, out_planes, expansion, stride) -> all three shortcut paths
    configs = [(Cin, Cin, 6, 1),    # identity shortcut
               (Cin, 32, 6, 1),     # 1x1-conv + BN shortcut
               (Cin, 32, 6, 2)]     # stride 2: no residual
    pkeys = jax.random.split(kp, len(configs))

    for cfg_key, (ci, co, exp, s) in zip(pkeys, configs):
        params, shortcut = make_block_params(cfg_key, ci, co, exp, s)
        out = jax.block_until_ready(
            block_forward(x, params, stride=s, shortcut=shortcut))
        ref = jax.block_until_ready(
            block_reference(x, params, stride=s, shortcut=shortcut,
                            dw_dtype=dw_dtype))
        assert out.shape == (N, co, (H - 1) // s + 1, (W - 1) // s + 1)
        assert out.dtype == jnp.float32
        err = float(jnp.max(jnp.abs(out - ref)))
        assert err < 2e-2, f"mismatch vs reference: max abs err {err}"

    print("KERNEL_OK")
</pallas_src>

<mosaic_0001>
module attributes {stable_mosaic.version = 11 : i64} {
  func.func @_block_kernel(%arg0: i32, %arg1: memref<1x16x16x16xf32, #tpu.memory_space<vmem>>, %arg2: memref<16x128xbf16, #tpu.memory_space<vmem>>, %arg3: memref<1x128xf32, #tpu.memory_space<vmem>>, %arg4: memref<9x1x128xf32, #tpu.memory_space<vmem>>, %arg5: memref<1x128xf32, #tpu.memory_space<vmem>>, %arg6: memref<128x16xbf16, #tpu.memory_space<vmem>>, %arg7: memref<1x16xf32, #tpu.memory_space<vmem>>, %arg8: memref<1x16x16x16xf32, #tpu.memory_space<vmem>>, %arg9: memref<54x16x128xbf16, #tpu.memory_space<vmem>>) attributes {dimension_semantics = [#tpu.dimension_semantics<parallel>], iteration_bounds = array<i64: 2>, scalar_prefetch = 0 : i64, scratch_operands = 1 : i64, tpu.core_type = #tpu.core_type<tc>, window_params = [{transform_indices = @transform_0, window_bounds = array<i64: 1, 16, 16, 16>}, {pipeline_mode = #tpu.pipeline_mode<synchronous>, transform_indices = @transform_1, window_bounds = array<i64: 16, 128>}, {pipeline_mode = #tpu.pipeline_mode<synchronous>, transform_indices = @transform_2, window_bounds = array<i64: 1, 128>}, {pipeline_mode = #tpu.pipeline_mode<synchronous>, transform_indices = @transform_3, window_bounds = array<i64: 9, 1, 128>}, {pipeline_mode = #tpu.pipeline_mode<synchronous>, transform_indices = @transform_4, window_bounds = array<i64: 1, 128>}, {pipeline_mode = #tpu.pipeline_mode<synchronous>, transform_indices = @transform_5, window_bounds = array<i64: 128, 16>}, {pipeline_mode = #tpu.pipeline_mode<synchronous>, transform_indices = @transform_6, window_bounds = array<i64: 1, 16>}, {transform_indices = @transform_7, window_bounds = array<i64: 1, 16, 16, 16>}]} {
    %cst = arith.constant 0.000000e+00 : bf16
    %0 = vector.broadcast %cst : bf16 to vector<1x16x128xbf16>
    %c0 = arith.constant 0 : index
    %c0_0 = arith.constant 0 : index
    %c0_1 = arith.constant 0 : index
    %1 = vector.load %arg9[%c0, %c0_0, %c0_1] : memref<54x16x128xbf16, #tpu.memory_space<vmem>>, vector<1x16x128xbf16>
    tpu.vector_store %arg9[%c0, %c0_0, %c0_1], %0 {strides = array<i32>} : memref<54x16x128xbf16, #tpu.memory_space<vmem>>, vector<1x16x128xbf16>,
    %c17 = arith.constant 17 : index
    %c0_2 = arith.constant 0 : index
    %c0_3 = arith.constant 0 : index
    %2 = vector.load %arg9[%c17, %c0_2, %c0_3] : memref<54x16x128xbf16, #tpu.memory_space<vmem>>, vector<1x16x128xbf16>
    tpu.vector_store %arg9[%c17, %c0_2, %c0_3], %0 {strides = array<i32>} : memref<54x16x128xbf16, #tpu.memory_space<vmem>>, vector<1x16x128xbf16>,
    %c18 = arith.constant 18 : index
    %c0_4 = arith.constant 0 : index
    %c0_5 = arith.constant 0 : index
    %3 = vector.load %arg9[%c18, %c0_4, %c0_5] : memref<54x16x128xbf16, #tpu.memory_space<vmem>>, vector<1x16x128xbf16>
    tpu.vector_store %arg9[%c18, %c0_4, %c0_5], %0 {strides = array<i32>} : memref<54x16x128xbf16, #tpu.memory_space<vmem>>, vector<1x16x128xbf16>,
    %c35 = arith.constant 35 : index
    %c0_6 = arith.constant 0 : index
    %c0_7 = arith.constant 0 : index
    %4 = vector.load %arg9[%c35, %c0_6, %c0_7] : memref<54x16x128xbf16, #tpu.memory_space<vmem>>, vector<1x16x128xbf16>
    tpu.vector_store %arg9[%c35, %c0_6, %c0_7], %0 {strides = array<i32>} : memref<54x16x128xbf16, #tpu.memory_space<vmem>>, vector<1x16x128xbf16>,
    %c36 = arith.constant 36 : index
    %c0_8 = arith.constant 0 : index
    %c0_9 = arith.constant 0 : index
    %5 = vector.load %arg9[%c36, %c0_8, %c0_9] : memref<54x16x128xbf16, #tpu.memory_space<vmem>>, vector<1x16x128xbf16>
    tpu.vector_store %arg9[%c36, %c0_8, %c0_9], %0 {strides = array<i32>} : memref<54x16x128xbf16, #tpu.memory_space<vmem>>, vector<1x16x128xbf16>,
    %c53 = arith.constant 53 : index
    %c0_10 = arith.constant 0 : index
    %c0_11 = arith.constant 0 : index
    %6 = vector.load %arg9[%c53, %c0_10, %c0_11] : memref<54x16x128xbf16, #tpu.memory_space<vmem>>, vector<1x16x128xbf16>
    tpu.vector_store %arg9[%c53, %c0_10, %c0_11], %0 {strides = array<i32>} : memref<54x16x128xbf16, #tpu.memory_space<vmem>>, vector<1x16x128xbf16>,
    %c0_12 = arith.constant 0 : index
    %c0_13 = arith.constant 0 : index
    %7 = vector.load %arg2[%c0_12, %c0_13] : memref<16x128xbf16, #tpu.memory_space<vmem>>, vector<16x128xbf16>
    %c0_14 = arith.constant 0 : index
    %c0_15 = arith.constant 0 : index
    %8 = vector.load %arg3[%c0_14, %c0_15] : memref<1x128xf32, #tpu.memory_space<vmem>>, vector<1x128xf32>
    %c0_16 = arith.constant 0 : index
    %c0_17 = arith.constant 0 : index
    %c0_18 = arith.constant 0 : index
    %9 = vector.load %arg4[%c0_16, %c0_17, %c0_18] : memref<9x1x128xf32, #tpu.memory_space<vmem>>, vector<9x1x128xf32>
    %c0_19 = arith.constant 0 : index
    %c0_20 = arith.constant 0 : index
    %10 = vector.load %arg5[%c0_19, %c0_20] : memref<1x128xf32, #tpu.memory_space<vmem>>, vector<1x128xf32>
    %c0_21 = arith.constant 0 : index
    %c0_22 = arith.constant 0 : index
    %11 = vector.load %arg6[%c0_21, %c0_22] : memref<128x16xbf16, #tpu.memory_space<vmem>>, vector<128x16xbf16>
    %c0_23 = arith.constant 0 : index
    %c0_24 = arith.constant 0 : index
    %12 = vector.load %arg7[%c0_23, %c0_24] : memref<1x16xf32, #tpu.memory_space<vmem>>, vector<1x16xf32>
    %c0_25 = arith.constant 0 : index
    %c0_26 = arith.constant 0 : index
    %c0_27 = arith.constant 0 : index
    %c0_28 = arith.constant 0 : index
    %13 = vector.load %arg1[%c0_25, %c0_26, %c0_27, %c0_28] : memref<1x16x16x16xf32, #tpu.memory_space<vmem>>, vector<1x16x16x16xf32>
    %14 = vector.shape_cast %13 : vector<1x16x16x16xf32> to vector<16x16x16xf32>
    %15 = vector.shape_cast %14 : vector<16x16x16xf32> to vector<256x16xf32>
    %16 = arith.truncf %15 : vector<256x16xf32> to vector<256x16xbf16>
    %cst_29 = arith.constant dense<0.000000e+00> : vector<256x128xf32>
    %17 = tpu.matmul %16, %7, %cst_29 {dimension_numbers = #tpu.dot_dimension_numbers<[1], [0], [0], [1], [0, 0, 1, 1], [], []>} : vector<256x16xbf16>, vector<16x128xbf16>, vector<256x128xf32> -> vector<256x128xf32>
    %18 = vector.broadcast %8 : vector<1x128xf32> to vector<256x128xf32>
    %19 = arith.addf %17, %18 : vector<256x128xf32>
    %cst_30 = arith.constant 0.000000e+00 : f32
    %20 = vector.broadcast %cst_30 : f32 to vector<256x128xf32>
    %21 = arith.maximumf %19, %20 : vector<256x128xf32>
    %22 = vector.shape_cast %21 : vector<256x128xf32> to vector<16x16x128xf32>
    %cst_31 = arith.constant 0.000000e+00 : f32
    %23 = vector.broadcast %cst_31 : f32 to vector<16x1x128xf32>
    %24 = arith.truncf %22 : vector<16x16x128xf32> to vector<16x16x128xbf16>
    %25 = vector.extract_strided_slice %22 {offsets = [0, 0, 0], sizes = [16, 15, 128], strides = [1, 1, 1]} : vector<16x16x128xf32> to vector<16x15x128xf32>
    %26 = tpu.concatenate %23, %25 in 1 : vector<16x1x128xf32>, vector<16x15x128xf32> -> vector<16x16x128xf32>
    %27 = arith.truncf %26 : vector<16x16x128xf32> to vector<16x16x128xbf16>
    %28 = vector.extract_strided_slice %22 {offsets = [0, 1, 0], sizes = [16, 15, 128], strides = [1, 1, 1]} : vector<16x16x128xf32> to vector<16x15x128xf32>
    %29 = tpu.concatenate %28, %23 in 1 : vector<16x15x128xf32>, vector<16x1x128xf32> -> vector<16x16x128xf32>
    %30 = arith.truncf %29 : vector<16x16x128xf32> to vector<16x16x128xbf16>
    %c1 = arith.constant 1 : index
    %c0_32 = arith.constant 0 : index
    %c0_33 = arith.constant 0 : index
    %31 = vector.load %arg9[%c1, %c0_32, %c0_33] : memref<54x16x128xbf16, #tpu.memory_space<vmem>>, vector<16x16x128xbf16>
    tpu.vector_store %arg9[%c1, %c0_32, %c0_33], %27 {strides = array<i32>} : memref<54x16x128xbf16, #tpu.memory_space<vmem>>, vector<16x16x128xbf16>,
    %c19 = arith.constant 19 : index
    %c0_34 = arith.constant 0 : index
    %c0_35 = arith.constant 0 : index
    %32 = vector.load %arg9[%c19, %c0_34, %c0_35] : memref<54x16x128xbf16, #tpu.memory_space<vmem>>, vector<16x16x128xbf16>
    tpu.vector_store %arg9[%c19, %c0_34, %c0_35], %24 {strides = array<i32>} : memref<54x16x128xbf16, #tpu.memory_space<vmem>>, vector<16x16x128xbf16>,
    %c37 = arith.constant 37 : index
    %c0_36 = arith.constant 0 : index
    %c0_37 = arith.constant 0 : index
    %33 = vector.load %arg9[%c37, %c0_36, %c0_37] : memref<54x16x128xbf16, #tpu.memory_space<vmem>>, vector<16x16x128xbf16>
    tpu.vector_store %arg9[%c37, %c0_36, %c0_37], %30 {strides = array<i32>} : memref<54x16x128xbf16, #tpu.memory_space<vmem>>, vector<16x16x128xbf16>,
    %cst_38 = arith.constant 0.000000e+00 : f32
    %34 = vector.broadcast %cst_38 : f32 to vector<16x16x128xf32>
    %c0_39 = arith.constant 0 : index
    %c0_40 = arith.constant 0 : index
    %c0_41 = arith.constant 0 : index
    %35 = vector.load %arg9[%c0_39, %c0_40, %c0_41] : memref<54x16x128xbf16, #tpu.memory_space<vmem>>, vector<16x16x128xbf16>
    %36 = arith.extf %35 : vector<16x16x128xbf16> to vector<16x16x128xf32>
    %37 = vector.extract_strided_slice %9 {offsets = [0, 0, 0], sizes = [1, 1, 128], strides = [1, 1, 1]} : vector<9x1x128xf32> to vector<1x1x128xf32>
    %38 = vector.shape_cast %37 : vector<1x1x128xf32> to vector<1x128xf32>
    %39 = vector.shape_cast %38 : vector<1x128xf32> to vector<1x1x128xf32>
    %40 = vector.broadcast %39 : vector<1x1x128xf32> to vector<16x16x128xf32>
    %41 = arith.mulf %36, %40 : vector<16x16x128xf32>
    %42 = arith.addf %34, %41 : vector<16x16x128xf32>
    %c18_42 = arith.constant 18 : index
    %c0_43 = arith.constant 0 : index
    %c0_44 = arith.constant 0 : index
    %43 = vector.load %arg9[%c18_42, %c0_43, %c0_44] : memref<54x16x128xbf16, #tpu.memory_space<vmem>>, vector<16x16x128xbf16>
    %44 = arith.extf %43 : vector<16x16x128xbf16> to vector<16x16x128xf32>
    %45 = vector.extract_strided_slice %9 {offsets = [1, 0, 0], sizes = [1, 1, 128], strides = [1, 1, 1]} : vector<9x1x128xf32> to vector<1x1x128xf32>
    %46 = vector.shape_cast %45 : vector<1x1x128xf32> to vector<1x128xf32>
    %47 = vector.shape_cast %46 : vector<1x128xf32> to vector<1x1x128xf32>
    %48 = vector.broadcast %47 : vector<1x1x128xf32> to vector<16x16x128xf32>
    %49 = arith.mulf %44, %48 : vector<16x16x128xf32>
    %50 = arith.addf %42, %49 : vector<16x16x128xf32>
    %c36_45 = arith.constant 36 : index
    %c0_46 = arith.constant 0 : index
    %c0_47 = arith.constant 0 : index
    %51 = vector.load %arg9[%c36_45, %c0_46, %c0_47] : memref<54x16x128xbf16, #tpu.memory_space<vmem>>, vector<16x16x128xbf16>
    %52 = arith.extf %51 : vector<16x16x128xbf16> to vector<16x16x128xf32>
    %53 = vector.extract_strided_slice %9 {offsets = [2, 0, 0], sizes = [1, 1, 128], strides = [1, 1, 1]} : vector<9x1x128xf32> to vector<1x1x128xf32>
    %54 = vector.shape_cast %53 : vector<1x1x128xf32> to vector<1x128xf32>
    %55 = vector.shape_cast %54 : vector<1x128xf32> to vector<1x1x128xf32>
    %56 = vector.broadcast %55 : vector<1x1x128xf32> to vector<16x16x128xf32>
    %57 = arith.mulf %52, %56 : vector<16x16x128xf32>
    %58 = arith.addf %50, %57 : vector<16x16x128xf32>
    %c1_48 = arith.constant 1 : index
    %c0_49 = arith.constant 0 : index
    %c0_50 = arith.constant 0 : index
    %59 = vector.load %arg9[%c1_48, %c0_49, %c0_50] : memref<54x16x128xbf16, #tpu.memory_space<vmem>>, vector<16x16x128xbf16>
    %60 = arith.extf %59 : vector<16x16x128xbf16> to vector<16x16x128xf32>
    %61 = vector.extract_strided_slice %9 {offsets = [3, 0, 0], sizes = [1, 1, 128], strides = [1, 1, 1]} : vector<9x1x128xf32> to vector<1x1x128xf32>
    %62 = vector.shape_cast %61 : vector<1x1x128xf32> to vector<1x128xf32>
    %63 = vector.shape_cast %62 : vector<1x128xf32> to vector<1x1x128xf32>
    %64 = vector.broadcast %63 : vector<1x1x128xf32> to vector<16x16x128xf32>
    %65 = arith.mulf %60, %64 : vector<16x16x128xf32>
    %66 = arith.addf %58, %65 : vector<16x16x128xf32>
    %c19_51 = arith.constant 19 : index
    %c0_52 = arith.constant 0 : index
    %c0_53 = arith.constant 0 : index
    %67 = vector.load %arg9[%c19_51, %c0_52, %c0_53] : memref<54x16x128xbf16, #tpu.memory_space<vmem>>, vector<16x16x128xbf16>
    %68 = arith.extf %67 : vector<16x16x128xbf16> to vector<16x16x128xf32>
    %69 = vector.extract_strided_slice %9 {offsets = [4, 0, 0], sizes = [1, 1, 128], strides = [1, 1, 1]} : vector<9x1x128xf32> to vector<1x1x128xf32>
    %70 = vector.shape_cast %69 : vector<1x1x128xf32> to vector<1x128xf32>
    %71 = vector.shape_cast %70 : vector<1x128xf32> to vector<1x1x128xf32>
    %72 = vector.broadcast %71 : vector<1x1x128xf32> to vector<16x16x128xf32>
    %73 = arith.mulf %68, %72 : vector<16x16x128xf32>
    %74 = arith.addf %66, %73 : vector<16x16x128xf32>
    %c37_54 = arith.constant 37 : index
    %c0_55 = arith.constant 0 : index
    %c0_56 = arith.constant 0 : index
    %75 = vector.load %arg9[%c37_54, %c0_55, %c0_56] : memref<54x16x128xbf16, #tpu.memory_space<vmem>>, vector<16x16x128xbf16>
    %76 = arith.extf %75 : vector<16x16x128xbf16> to vector<16x16x128xf32>
    %77 = vector.extract_strided_slice %9 {offsets = [5, 0, 0], sizes = [1, 1, 128], strides = [1, 1, 1]} : vector<9x1x128xf32> to vector<1x1x128xf32>
    %78 = vector.shape_cast %77 : vector<1x1x128xf32> to vector<1x128xf32>
    %79 = vector.shape_cast %78 : vector<1x128xf32> to vector<1x1x128xf32>
    %80 = vector.broadcast %79 : vector<1x1x128xf32> to vector<16x16x128xf32>
    %81 = arith.mulf %76, %80 : vector<16x16x128xf32>
    %82 = arith.addf %74, %81 : vector<16x16x128xf32>
    %c2 = arith.constant 2 : index
    %c0_57 = arith.constant 0 : index
    %c0_58 = arith.constant 0 : index
    %83 = vector.load %arg9[%c2, %c0_57, %c0_58] : memref<54x16x128xbf16, #tpu.memory_space<vmem>>, vector<16x16x128xbf16>
    %84 = arith.extf %83 : vector<16x16x128xbf16> to vector<16x16x128xf32>
    %85 = vector.extract_strided_slice %9 {offsets = [6, 0, 0], sizes = [1, 1, 128], strides = [1, 1, 1]} : vector<9x1x128xf32> to vector<1x1x128xf32>
    %86 = vector.shape_cast %85 : vector<1x1x128xf32> to vector<1x128xf32>
    %87 = vector.shape_cast %86 : vector<1x128xf32> to vector<1x1x128xf32>
    %88 = vector.broadcast %87 : vector<1x1x128xf32> to vector<16x16x128xf32>
    %89 = arith.mulf %84, %88 : vector<16x16x128xf32>
    %90 = arith.addf %82, %89 : vector<16x16x128xf32>
    %c20 = arith.constant 20 : index
    %c0_59 = arith.constant 0 : index
    %c0_60 = arith.constant 0 : index
    %91 = vector.load %arg9[%c20, %c0_59, %c0_60] : memref<54x16x128xbf16, #tpu.memory_space<vmem>>, vector<16x16x128xbf16>
    %92 = arith.extf %91 : vector<16x16x128xbf16> to vector<16x16x128xf32>
    %93 = vector.extract_strided_slice %9 {offsets = [7, 0, 0], sizes = [1, 1, 128], strides = [1, 1, 1]} : vector<9x1x128xf32> to vector<1x1x128xf32>
    %94 = vector.shape_cast %93 : vector<1x1x128xf32> to vector<1x128xf32>
    %95 = vector.shape_cast %94 : vector<1x128xf32> to vector<1x1x128xf32>
    %96 = vector.broadcast %95 : vector<1x1x128xf32> to vector<16x16x128xf32>
    %97 = arith.mulf %92, %96 : vector<16x16x128xf32>
    %98 = arith.addf %90, %97 : vector<16x16x128xf32>
    %c38 = arith.constant 38 : index
    %c0_61 = arith.constant 0 : index
    %c0_62 = arith.constant 0 : index
    %99 = vector.load %arg9[%c38, %c0_61, %c0_62] : memref<54x16x128xbf16, #tpu.memory_space<vmem>>, vector<16x16x128xbf16>
    %100 = arith.extf %99 : vector<16x16x128xbf16> to vector<16x16x128xf32>
    %101 = vector.extract_strided_slice %9 {offsets = [8, 0, 0], sizes = [1, 1, 128], strides = [1, 1, 1]} : vector<9x1x128xf32> to vector<1x1x128xf32>
    %102 = vector.shape_cast %101 : vector<1x1x128xf32> to vector<1x128xf32>
    %103 = vector.shape_cast %102 : vector<1x128xf32> to vector<1x1x128xf32>
    %104 = vector.broadcast %103 : vector<1x1x128xf32> to vector<16x16x128xf32>
    %105 = arith.mulf %100, %104 : vector<16x16x128xf32>
    %106 = arith.addf %98, %105 : vector<16x16x128xf32>
    %107 = vector.shape_cast %10 : vector<1x128xf32> to vector<1x1x128xf32>
    %108 = vector.broadcast %107 : vector<1x1x128xf32> to vector<16x16x128xf32>
    %109 = arith.addf %106, %108 : vector<16x16x128xf32>
    %cst_63 = arith.constant 0.000000e+00 : f32
    %110 = vector.broadcast %cst_63 : f32 to vector<16x16x128xf32>
    %111 = arith.maximumf %109, %110 : vector<16x16x128xf32>
    %112 = vector.shape_cast %111 : vector<16x16x128xf32> to vector<256x128xf32>
    %113 = arith.truncf %112 : vector<256x128xf32> to vector<256x128xbf16>
    %cst_64 = arith.constant dense<0.000000e+00> : vector<256x16xf32>
    %114 = tpu.matmul %113, %11, %cst_64 {dimension_numbers = #tpu.dot_dimension_numbers<[1], [0], [0], [1], [0, 0, 1, 1], [], []>} : vector<256x128xbf16>, vector<128x16xbf16>, vector<256x16xf32> -> vector<256x16xf32>
    %115 = vector.broadcast %12 : vector<1x16xf32> to vector<256x16xf32>
    %116 = arith.addf %114, %115 : vector<256x16xf32>
    %117 = arith.addf %116, %15 : vector<256x16xf32>
    %118 = vector.shape_cast %117 : vector<256x16xf32> to vector<1x16x16x16xf32>
    %c0_65 = arith.constant 0 : index
    %c0_66 = arith.constant 0 : index
    %c0_67 = arith.constant 0 : index
    %c0_68 = arith.constant 0 : index
    %119 = vector.load %arg8[%c0_65, %c0_66, %c0_67, %c0_68] : memref<1x16x16x16xf32, #tpu.memory_space<vmem>>, vector<1x16x16x16xf32>
    tpu.vector_store %arg8[%c0_65, %c0_66, %c0_67, %c0_68], %118 {strides = array<i32>} : memref<1x16x16x16xf32, #tpu.memory_space<vmem>>, vector<1x16x16x16xf32>,
    return
  }
  func.func @transform_0(%arg0: i32) -> (i32, i32, i32, i32) {
    %c0_i32 = arith.constant 0 : i32
    %c0_i32_0 = arith.constant 0 : i32
    %c0_i32_1 = arith.constant 0 : i32
    %c0_i32_2 = arith.constant 0 : i32
    return %arg0, %c0_i32, %c0_i32_0, %c0_i32_1 : i32, i32, i32, i32
  }
  func.func @transform_1(%arg0: i32) -> (i32, i32) {
    %c0_i32 = arith.constant 0 : i32
    %c0_i32_0 = arith.constant 0 : i32
    %c0_i32_1 = arith.constant 0 : i32
    return %c0_i32, %c0_i32_0 : i32, i32
  }
  func.func @transform_2(%arg0: i32) -> (i32, i32) {
    %c0_i32 = arith.constant 0 : i32
    %c0_i32_0 = arith.constant 0 : i32
    %c0_i32_1 = arith.constant 0 : i32
    return %c0_i32, %c0_i32_0 : i32, i32
  }
  func.func @transform_3(%arg0: i32) -> (i32, i32, i32) {
    %c0_i32 = arith.constant 0 : i32
    %c0_i32_0 = arith.constant 0 : i32
    %c0_i32_1 = arith.constant 0 : i32
    %c0_i32_2 = arith.constant 0 : i32
    return %c0_i32, %c0_i32_0, %c0_i32_1 : i32, i32, i32
  }
  func.func @transform_4(%arg0: i32) -> (i32, i32) {
    %c0_i32 = arith.constant 0 : i32
    %c0_i32_0 = arith.constant 0 : i32
    %c0_i32_1 = arith.constant 0 : i32
    return %c0_i32, %c0_i32_0 : i32, i32
  }
  func.func @transform_5(%arg0: i32) -> (i32, i32) {
    %c0_i32 = arith.constant 0 : i32
    %c0_i32_0 = arith.constant 0 : i32
    %c0_i32_1 = arith.constant 0 : i32
    return %c0_i32, %c0_i32_0 : i32, i32
  }
  func.func @transform_6(%arg0: i32) -> (i32, i32) {
    %c0_i32 = arith.constant 0 : i32
    %c0_i32_0 = arith.constant 0 : i32
    %c0_i32_1 = arith.constant 0 : i32
    return %c0_i32, %c0_i32_0 : i32, i32
  }
  func.func @transform_7(%arg0: i32) -> (i32, i32, i32, i32) {
    %c0_i32 = arith.constant 0 : i32
    %c0_i32_0 = arith.constant 0 : i32
    %c0_i32_1 = arith.constant 0 : i32
    %c0_i32_2 = arith.constant 0 : i32
    return %arg0, %c0_i32, %c0_i32_0, %c0_i32_1 : i32, i32, i32, i32
  }
}

</mosaic_0001>

<bundles_post_ra>
// kernel: _block_forward_impl.1
= control target key start
LH: loop header
LB: loop body
LE: loop exit
PB: predicated region body
PF: predicated region fallthrough
CT: control target
= control target key end

     0   :  { %s3695_s24 = smov 0   ;;  %s4812_s0 = inlined_call_operand.vmem [shape: f32[2,16,16,16], index: 0, kind: input, shape index: {}]   ;;  %s4813_s1 = inlined_call_operand.vmem [shape: bf16[16,128], index: 1, kind: input, shape index: {}]   ;;  %s4814_s2 = inlined_call_operand.vmem [shape: f32[1,128], index: 2, kind: input, shape index: {}]   ;;  %s4815_s3 = inlined_call_operand.vmem [shape: f32[9,1,128], index: 3, kind: input, shape index: {}]   ;;  %s4816_s4 = inlined_call_operand.vmem [shape: f32[1,128], index: 4, kind: input, shape index: {}]   ;;  %s4817_s5 = inlined_call_operand.vmem [shape: bf16[128,16], index: 5, kind: input, shape index: {}]   ;;  %s4818_s6 = inlined_call_operand.vmem [shape: f32[1,16], index: 6, kind: input, shape index: {}]   ;;  %s4819_s7 = inlined_call_operand.vmem [shape: f32[2,16,16,16], index: 7, kind: output, shape index: {}]  }
   0x1 LB: > { %s2499_s25 = sadd.s32 4294967295, %s3652_s24   ;;  %p2503_p0 = scmp.ge.s32.totalorder %s3652_s24, 1  ;;  %s3652_s24 = sphi %s3695_s24, %s17_s24  }
   0x2   : > { %p237_p1 = scmp.lt.s32.totalorder %s3652_s24, 3 }
   0x4   : > { %p238_p2 = pnand %p2503_p0, %p237_p1 }
   0x5   : > { %p269_p3 = scmp.lt.s32.totalorder (!%p238_p2), %s2499_s25, 1 }
   0x6   : > { %241 = sbr.rel (%p238_p2) target bundleno = 584 (0x248), region = 48 }
   0xb   : > { %v2564_v0 = vld [vmem:[%s4813_s1] sm:$0xff]  ;;  %s4821_s25 = smov (!%p269_p3, %s2499_s25), 1  ;;  %vm384_vm0 = vcmask 130048   ;;  %v3654_v31 = vmov 0   ;;  %v2572_v38 = vld [vmem:[%s4817_s5 + $0x38] sm:$0xff]  ;;  %v2571_v39 = vld [vmem:[%s4817_s5 + $0x30] sm:$0xff] }
   0xc   : > { %440 = vmatpush.bf16.msra.mxu0 %v2564_v0  ;;  %3569 = vmatpush.bf16.msra.mxu3 %v2564_v0  ;;  %s2562_s28 = sshll.u32 %s4821_s25, 8  ;;  %280 = vst [vmem:[#allocation2] sm:$0xf] %v3654_v31  ;;  %v2570_v40 = vld [vmem:[%s4817_s5 + $0x28] sm:$0xff]  ;;  %v2569_v43 = vld [vmem:[%s4817_s5 + $0x20] sm:$0xff]  ;;  %v2568_v50 = vld [vmem:[%s4817_s5 + $0x18] sm:$0xff] }
   0xd   : > { %s3714_s8 = scalar_lea.vmem %s4812_s0, %s2562_s28  ;;  %281 = vst [vmem:[#allocation2 + $0x4] sm:$0xf] %v3654_v31  ;;  %2291 = vmatpush.bf16.msra.mxu1 %v2572_v38  ;;  %3570 = vmatpush.bf16.msra.mxu2 %v2572_v38  ;;  %v3769_v44 = vld [vmem:[%s4814_s2] ss:$0 sm:$0xff]  ;;  %v2567_v53 = vld [vmem:[%s4817_s5 + $0x10] sm:$0xff]  ;;  %v2566_v61 = vld [vmem:[%s4817_s5 + $0x8] sm:$0xff]  ;;  %s4413_s16 = scalar_lea.vmem %s4819_s7, %s2562_s28 }
   0xe   : > { %v327_v1 = vld [vmem:[%s3714_s8] sm:$0xff]  ;;  %v328_v2 = vld [vmem:[%s3714_s8 + $0x8] sm:$0xff]  ;;  %v329_v4 = vld [vmem:[%s3714_s8 + $0x10] sm:$0xff]  ;;  %286 = vst [vmem:[#allocation2 + $0x90] sm:$0xf] %v3654_v31  ;;  %vm618_vm1 = vcmask 1040384  }
   0xf   : > { %v359_v3 = vpack.c.bf16 %v328_v2, %v327_v1  ;;  %v330_v5 = vld [vmem:[%s3714_s8 + $0x18] sm:$0xff]  ;;  %v331_v7 = vld [vmem:[%s3714_s8 + $0x20] sm:$0xff]  ;;  %v332_v8 = vld [vmem:[%s3714_s8 + $0x28] sm:$0xff]  ;;  %287 = vst [vmem:[#allocation2 + $0x94] sm:$0xf] %v3654_v31  ;;  %vm747_vm2 = vcmask 1046528  }
  0x10   : > { %v360_v6 = vpack.c.bf16 %v330_v5, %v329_v4  ;;  %v361_v9 = vpack.c.bf16 %v332_v8, %v331_v7  ;;  %v333_v10 = vld [vmem:[%s3714_s8 + $0x30] sm:$0xff]  ;;  %v334_v11 = vld [vmem:[%s3714_s8 + $0x38] sm:$0xff]  ;;  %v335_v16 = vld [vmem:[%s3714_s8 + $0x40] sm:$0xff]  ;;  %292 = vst [vmem:[#allocation2 + $0x120] sm:$0xf] %v3654_v31 }
  0x11   : > { %2512 = vmatmul.msk.bf16.vlgmr.msra.gmra.mxu0 %vm384_vm0, %v359_v3  ;;  %v362_v12 = vpack.c.bf16 %v334_v11, %v333_v10  ;;  %v345_v13 = vld [vmem:[%s3714_s8 + $0x90] sm:$0xff]  ;;  %v346_v14 = vld [vmem:[%s3714_s8 + $0x98] sm:$0xff]  ;;  %v336_v17 = vld [vmem:[%s3714_s8 + $0x48] sm:$0xff]  ;;  %293 = vst [vmem:[#allocation2 + $0x124] sm:$0xf] %v3654_v31  ;;  %2292 = vmatpush.bf16.msra.mxu1 %v2571_v39 }
  0x12   : > { %v368_v15 = vpack.c.bf16 %v346_v14, %v345_v13  ;;  %v363_v18 = vpack.c.bf16 %v336_v17, %v335_v16  ;;  %v347_v19 = vld [vmem:[%s3714_s8 + $0xa0] sm:$0xff]  ;;  %v348_v20 = vld [vmem:[%s3714_s8 + $0xa8] sm:$0xff]  ;;  %v337_v22 = vld [vmem:[%s3714_s8 + $0x50] sm:$0xff]  ;;  %283 = vst [vmem:[#allocation2 + $0x88] sm:$0xf] %v3654_v31  ;;  %3571 = vmatpush.bf16.msra.mxu2 %v2571_v39 }
  0x13   : > { %v369_v21 = vpack.c.bf16 %v348_v20, %v347_v19  ;;  %v338_v23 = vld [vmem:[%s3714_s8 + $0x58] sm:$0xff]  ;;  %v339_v25 = vld [vmem:[%s3714_s8 + $0x60] sm:$0xff]  ;;  %v340_v26 = vld [vmem:[%s3714_s8 + $0x68] sm:$0xff]  ;;  %284 = vst [vmem:[#allocation2 + $0x8c] sm:$0xf] %v3654_v31 }
  0x14   : > { %2521 = vmatmul.msk.bf16.vlgmr.msra.gmra.mxu3 %vm384_vm0, %v368_v15  ;;  %v364_v24 = vpack.c.bf16 %v338_v23, %v337_v22  ;;  %v365_v27 = vpack.c.bf16 %v340_v26, %v339_v25  ;;  %v349_v28 = vld [vmem:[%s3714_s8 + $0xb0] sm:$0xff]  ;;  %v350_v29 = vld [vmem:[%s3714_s8 + $0xb8] sm:$0xff]  ;;  %v351_v35 = vld [vmem:[%s3714_s8 + $0xc0] sm:$0xff]  ;;  %289 = vst [vmem:[#allocation2 + $0x118] sm:$0xf] %v3654_v31 }
  0x15   : > { %v370_v30 = vpack.c.bf16 %v350_v29, %v349_v28  ;;  %v341_v32 = vld [vmem:[%s3714_s8 + $0x70] sm:$0xff]  ;;  %v342_v33 = vld [vmem:[%s3714_s8 + $0x78] sm:$0xff]  ;;  %v352_v36 = vld [vmem:[%s3714_s8 + $0xc8] sm:$0xff]  ;;  %290 = vst [vmem:[#allocation2 + $0x11c] sm:$0xf] %v3654_v31  ;;  %2293 = vmatpush.bf16.msra.mxu1 %v2570_v40 }
  0x16   : > { %v366_v34 = vpack.c.bf16 %v342_v33, %v341_v32  ;;  %v371_v37 = vpack.c.bf16 %v352_v36, %v351_v35  ;;  %295 = vst [vmem:[#allocation2 + $0x1a8] sm:$0xf] %v3654_v31  ;;  %v343_v41 = vld [vmem:[%s3714_s8 + $0x80] sm:$0xff]  ;;  %v344_v42 = vld [vmem:[%s3714_s8 + $0x88] sm:$0xff]  ;;  %3572 = vmatpush.bf16.msra.mxu2 %v2570_v40  ;;  %v353_v47 = vld [vmem:[%s3714_s8 + $0xd0] sm:$0xff] }
  0x17   : > { %296 = vst [vmem:[#allocation2 + $0x1ac] sm:$0xf] %v3654_v31  ;;  %v367_v45 = vpack.c.bf16 %v344_v42, %v343_v41  ;;  %v354_v48 = vld [vmem:[%s3714_s8 + $0xd8] sm:$0xff]  ;;  %v2814_v52 = vld [vmem:[#allocation2] sm:$0xff]   ;;  %v2878_v55 = vld [vmem:[#allocation2 + $0x90] sm:$0xff]  }
  0x18   : > { %v372_v49 = vpack.c.bf16 %v354_v48, %v353_v47  ;;  %v2815_v57 = vunpack.c.l.bf16 %v2814_v52  ;;  %v2816_v58 = vunpack.c.h.bf16 %v2814_v52  ;;  %v3785_v59 = vld [vmem:[%s4815_s3] ss:$0 sm:$0xff]  ;;  %v2879_v62 = vunpack.c.l.bf16 %v2878_v55  ;;  %v3794_v0 = vld [vmem:[%s4815_s3 + $0x1] ss:$0 sm:$0xff]  ;;  %v3806_v15 = vld [vmem:[%s4815_s3 + $0x2] ss:$0 sm:$0xff] }
  0x19   : > { %2294 = vmatpush.bf16.msra.mxu1 %v2569_v43  ;;  %v2880_v63 = vunpack.c.h.bf16 %v2878_v55  ;;  %v2942_v3 = vld [vmem:[#allocation2 + $0x120] sm:$0xff]  }
  0x1a   : > { %3573 = vmatpush.bf16.msra.mxu2 %v2569_v43  ;;  %v1042_v4 = vmul.f32 %v3785_v59, %v2815_v57  ;;  %v1043_v5 = vmul.f32 %v3785_v59, %v2816_v58  ;;  %v2565_v10 = vld [vmem:[%s4817_s5] sm:$0xff]  ;;  %v1173_v11 = vmul.f32 %v3794_v0, %v2879_v62  ;;  %v2943_v13 = vunpack.c.l.bf16 %v2942_v3 }
  0x1b   : > { %v2944_v14 = vunpack.c.h.bf16 %v2942_v3  ;;  %v355_v23 = vld [vmem:[%s3714_s8 + $0xe0] sm:$0xff] }
  0x1c   : > { %v1304_v28 = vmul.f32 %v3806_v15, %v2943_v13  ;;  %v3830_v40 = vld [vmem:[%s4815_s3 + $0x4] ss:$0 sm:$0xff]  ;;  %v357_v13 = vld [vmem:[%s3714_s8 + $0xf0] sm:$0xff] }
  0x1d   : > { %2295 = vmatpush.bf16.msra.mxu1 %v2568_v50  ;;  %v1305_v32 = vmul.f32 %v3806_v15, %v2944_v14  ;;  %v358_v14 = vld [vmem:[%s3714_s8 + $0xf8] sm:$0xff] }
  0x1e   : > { %3574 = vmatpush.bf16.msra.mxu2 %v2568_v50 }
  0x21   : > { %2513 = vmatmul.msk.bf16.gmra.mxu0 %vm384_vm0, %v360_v6  ;;  %2296 = vmatpush.bf16.msra.mxu1 %v2567_v53 }
  0x22   : > { %3575 = vmatpush.bf16.msra.mxu2 %v2567_v53 }
  0x24   : > { %2522 = vmatmul.msk.bf16.gmra.mxu3 %vm384_vm0, %v369_v21 }
  0x25   : > { %2297 = vmatpush.bf16.msra.mxu1 %v2566_v61 }
  0x26   : > { %3576 = vmatpush.bf16.msra.mxu2 %v2566_v61 }
  0x29   : > { %2298 = vmatpush.bf16.msra.mxu1 %v2565_v10 }
  0x2a   : > { %3577 = vmatpush.bf16.msra.mxu2 %v2565_v10 }
  0x31   : > { %2514 = vmatmul.msk.bf16.gmra.mxu0 %vm384_vm0, %v361_v9 }
  0x34   : > { %2523 = vmatmul.msk.bf16.gmra.mxu3 %vm384_vm0, %v370_v30  ;;  %v3821_v30 = vld [vmem:[%s4815_s3 + $0x3] ss:$0 sm:$0xff] }
  0x41   : > { %2515 = vmatmul.msk.bf16.gmra.mxu0 %vm384_vm0, %v362_v12  ;;  %v1174_v12 = vmul.f32 %v3794_v0, %v2880_v63 }
  0x43   : > { %v1206_v31 = vadd.f32 %v1174_v12, %v1043_v5  ;;  %v3855_v12 = vld [vmem:[%s4815_s3 + $0x6] ss:$0 sm:$0xff] }
  0x44   : > { %2524 = vmatmul.msk.bf16.gmra.mxu3 %vm384_vm0, %v371_v37 }
  0x45   : > { %v1337_v37 = vadd.f32 %v1305_v32, %v1206_v31  ;;  %v3870_v32 = vld [vmem:[%s4815_s3 + $0x8] ss:$0 sm:$0xff] }
  0x51   : > { %2516 = vmatmul.msk.bf16.gmra.mxu0 %vm384_vm0, %v363_v18 }
  0x54   : > { %2525 = vmatmul.msk.bf16.gmra.mxu3 %vm384_vm0, %v372_v49 }
  0x61   : > { %2517 = vmatmul.msk.bf16.gmra.mxu0 %vm384_vm0, %v364_v24  ;;  %v356_v24 = vld [vmem:[%s3714_s8 + $0xe8] sm:$0xff] }
  0x62   : > { %v373_v25 = vpack.c.bf16 %v356_v24, %v355_v23 }
  0x64   : > { %2526 = vmatmul.msk.bf16.gmra.mxu3 %vm384_vm0, %v373_v25 }
  0x71   : > { %2518 = vmatmul.msk.bf16.gmra.mxu0 %vm384_vm0, %v365_v27  ;;  %v1205_v27 = vadd.f32 %v1173_v11, %v1042_v4 }
  0x73   : > { %v1336_v35 = vadd.f32 %v1304_v28, %v1205_v27 }
  0x81   : > { %2519 = vmatmul.msk.bf16.gmra.mxu0 %vm384_vm0, %v366_v34 }
  0x8e   : > { %v442_v46 = vpop.f32.mrf.mxu0 }
  0x8f   : > { %v443_v51 = vadd.f32 %v3769_v44, %v442_v46 }
  0x91   : > { %2520 = vmatmul.msk.bf16.gmra.mxu0 %vm384_vm0, %v367_v45  ;;  %v522_v54 = vmax.f32 %v443_v51, 0.0  ;;  %v3836_v45 = vld [vmem:[%s4815_s3 + $0x5] ss:$0 sm:$0xff] }
  0x93   : > { %v619_v1 = vrot.slane %v522_v54, 7  ;;  %v748_v6 = vrot.slane %v522_v54, 1 }
  0x95   : > { %v699_v16 = vsel %vm618_vm1, 0.0, %v619_v1 }
  0x96   : > { %v444_v56 = vpop.f32.mrf.mxu0 }
  0x97   : > { %v445_v60 = vadd.f32 %v3769_v44, %v444_v56 }
  0x99   : > { %v523_v2 = vmax.f32 %v445_v60, 0.0 }
  0x9b   : > { %v620_v7 = vrot.slane %v523_v2, 7  ;;  %v749_v8 = vrot.slane %v523_v2, 1  ;;  %v2656_v9 = vpack.c.bf16 %v523_v2, %v522_v54 }
  0x9d   : > { %v621_v17 = vsel %vm618_vm1, %v619_v1, %v620_v7  ;;  %v750_v18 = vsel %vm747_vm2, %v748_v6, %v749_v8  ;;  %v828_v19 = vsel %vm747_vm2, %v749_v8, 0.0  ;;  %v3071_v39 = vunpack.c.l.bf16 %v2656_v9 }
  0x9e   : > { %v2576_v20 = vpack.c.bf16 %v621_v17, %v699_v16  ;;  %v3812_v21 = vpack.c.bf16 %v828_v19, %v750_v18  ;;  %v447_v22 = vpop.f32.mrf.mxu0  ;;  %v3072_v42 = vunpack.c.h.bf16 %v2656_v9 }
  0x9f   : > { %v448_v26 = vadd.f32 %v3769_v44, %v447_v22  ;;  %v1566_v53 = vmul.f32 %v3830_v40, %v3071_v39  ;;  %v1175_v54 = vmul.f32 %v3794_v0, %v3071_v39 }
  0xa0   : > { %v3007_v29 = vunpack.c.l.bf16 %v2576_v20  ;;  %v3008_v33 = vunpack.c.h.bf16 %v2576_v20  ;;  %v3135_v43 = vunpack.c.l.bf16 %v3812_v21  ;;  %v3136_v49 = vunpack.c.h.bf16 %v3812_v21  ;;  %v3864_v20 = vld [vmem:[%s4815_s3 + $0x7] ss:$0 sm:$0xff] }
  0xa1   : > { %v524_v34 = vmax.f32 %v448_v26, 0.0  ;;  %v1567_v55 = vmul.f32 %v3830_v40, %v3072_v42  ;;  %v1176_v58 = vmul.f32 %v3794_v0, %v3072_v42  ;;  %v374_v21 = vpack.c.bf16 %v358_v14, %v357_v13 }
  0xa2   : > { %v1435_v36 = vmul.f32 %v3821_v30, %v3007_v29  ;;  %v1436_v38 = vmul.f32 %v3821_v30, %v3008_v33  ;;  %v1044_v50 = vmul.f32 %v3785_v59, %v3007_v29  ;;  %v1697_v56 = vmul.f32 %v3836_v45, %v3135_v43 }
  0xa3   : > { %v622_v47 = vrot.slane %v524_v34, 7  ;;  %v1045_v57 = vmul.f32 %v3785_v59, %v3008_v33  ;;  %v751_v60 = vrot.slane %v524_v34, 1  ;;  %v1698_v3 = vmul.f32 %v3836_v45, %v3136_v49  ;;  %2527 = vmatmul.msk.bf16.gmra.mxu3 %vm384_vm0, %v374_v21 }
  0xa4   : > { %v1467_v48 = vadd.f32 %v1435_v36, %v1336_v35  ;;  %v1468_v52 = vadd.f32 %v1436_v38, %v1337_v37  ;;  %v1207_v4 = vadd.f32 %v1175_v54, %v1044_v50  ;;  %v1306_v17 = vmul.f32 %v3806_v15, %v3135_v43 }
  0xa5   : > { %v700_v1 = vsel %vm618_vm1, 0.0, %v622_v47  ;;  %v1208_v16 = vadd.f32 %v1176_v58, %v1045_v57  ;;  %v1307_v22 = vmul.f32 %v3806_v15, %v3136_v49 }
  0xa6   : > { %v449_v41 = vpop.f32.mrf.mxu0  ;;  %v1598_v2 = vadd.f32 %v1566_v53, %v1467_v48  ;;  %v1599_v8 = vadd.f32 %v1567_v55, %v1468_v52  ;;  %v1338_v26 = vadd.f32 %v1306_v17, %v1207_v4 }
  0xa7   : > { %v450_v46 = vadd.f32 %v3769_v44, %v449_v41  ;;  %v1339_v38 = vadd.f32 %v1307_v22, %v1208_v16 }
  0xa8   : > { %v1729_v28 = vadd.f32 %v1697_v56, %v1598_v2  ;;  %v1730_v29 = vadd.f32 %v1698_v3, %v1599_v8  ;;  %v3886_v56 = vld [vmem:[%s4816_s4] ss:$0 sm:$0xff] }
  0xa9   : > { %v525_v51 = vmax.f32 %v450_v46, 0.0 }
  0xab   : > { %v623_v61 = vrot.slane %v525_v51, 7  ;;  %v752_v62 = vrot.slane %v525_v51, 1  ;;  %v2661_v63 = vpack.c.bf16 %v525_v51, %v524_v34 }
  0xad   : > { %v624_v5 = vsel %vm618_vm1, %v622_v47, %v623_v61  ;;  %v753_v6 = vsel %vm747_vm2, %v751_v60, %v752_v62  ;;  %v829_v7 = vsel %vm747_vm2, %v752_v62, 0.0  ;;  %v3263_v19 = vunpack.c.l.bf16 %v2661_v63 }
  0xae   : > { %v2581_v9 = vpack.c.bf16 %v624_v5, %v700_v1  ;;  %v2741_v10 = vpack.c.bf16 %v829_v7, %v753_v6  ;;  %v452_v11 = vpop.f32.mrf.mxu0  ;;  %v3264_v25 = vunpack.c.h.bf16 %v2661_v63 }
  0xaf   : > { %v453_v18 = vadd.f32 %v3769_v44, %v452_v11  ;;  %v1961_v37 = vmul.f32 %v3864_v20, %v3263_v19  ;;  %v1568_v41 = vmul.f32 %v3830_v40, %v3263_v19  ;;  %v1177_v62 = vmul.f32 %v3794_v0, %v3263_v19 }
  0xb0   : > { %v3199_v23 = vunpack.c.l.bf16 %v2581_v9  ;;  %v3200_v24 = vunpack.c.h.bf16 %v2581_v9  ;;  %v3327_v31 = vunpack.c.l.bf16 %v2741_v10  ;;  %v3328_v35 = vunpack.c.h.bf16 %v2741_v10 }
  0xb1   : > { %v526_v27 = vmax.f32 %v453_v18, 0.0  ;;  %v1962_v46 = vmul.f32 %v3864_v20, %v3264_v25  ;;  %v1569_v51 = vmul.f32 %v3830_v40, %v3264_v25  ;;  %v1178_v10 = vmul.f32 %v3794_v0, %v3264_v25 }
  0xb2   : > { %v1829_v33 = vmul.f32 %v3855_v12, %v3199_v23  ;;  %v1830_v34 = vmul.f32 %v3855_v12, %v3200_v24  ;;  %v1437_v36 = vmul.f32 %v3821_v30, %v3199_v23  ;;  %v1438_v39 = vmul.f32 %v3821_v30, %v3200_v24 }
  0xb3   : > { %v625_v48 = vrot.slane %v526_v27, 7  ;;  %v2093_v49 = vmul.f32 %v3870_v32, %v3327_v31  ;;  %v2094_v55 = vmul.f32 %v3870_v32, %v3328_v35  ;;  %v1046_v57 = vmul.f32 %v3785_v59, %v3199_v23 }
  0xb4   : > { %v1861_v42 = vadd.f32 %v1829_v33, %v1729_v28  ;;  %v1862_v43 = vadd.f32 %v1830_v34, %v1730_v29  ;;  %v1469_v47 = vadd.f32 %v1437_v36, %v1338_v26  ;;  %v1470_v50 = vadd.f32 %v1438_v39, %v1339_v38 }
  0xb5   : > { %v754_v58 = vrot.slane %v526_v27, 1  ;;  %v1699_v2 = vmul.f32 %v3836_v45, %v3327_v31  ;;  %v1047_v3 = vmul.f32 %v3785_v59, %v3200_v24  ;;  %v701_v4 = vsel %vm618_vm1, 0.0, %v625_v48 }
  0xb6   : > { %v454_v52 = vpop.f32.mrf.mxu0  ;;  %v1993_v53 = vadd.f32 %v1961_v37, %v1861_v42  ;;  %v1994_v54 = vadd.f32 %v1962_v46, %v1862_v43  ;;  %v1600_v61 = vadd.f32 %v1568_v41, %v1469_v47  ;;  %v1601_v6 = vadd.f32 %v1569_v51, %v1470_v50 }
  0xb7   : > { %v455_v60 = vadd.f32 %v3769_v44, %v454_v52  ;;  %v1700_v7 = vmul.f32 %v3836_v45, %v3328_v35  ;;  %v1209_v11 = vadd.f32 %v1177_v62, %v1046_v57  ;;  %v1210_v21 = vadd.f32 %v1178_v10, %v1047_v3 }
  0xb8   : > { %v2125_v63 = vadd.f32 %v2093_v49, %v1993_v53  ;;  %v2126_v1 = vadd.f32 %v2094_v55, %v1994_v54  ;;  %v1731_v17 = vadd.f32 %v1699_v2, %v1600_v61  ;;  %v1308_v22 = vmul.f32 %v3806_v15, %v3327_v31 }
  0xb9   : > { %v527_v5 = vmax.f32 %v455_v60, 0.0  ;;  %v1309_v36 = vmul.f32 %v3806_v15, %v3328_v35  ;;  %v1732_v37 = vadd.f32 %v1700_v7, %v1601_v6 }
  0xba   : > { %v2160_v8 = vadd.f32 %v3886_v56, %v2125_v63  ;;  %v2161_v9 = vadd.f32 %v3886_v56, %v2126_v1  ;;  %v1340_v39 = vadd.f32 %v1308_v22, %v1209_v11 }
  0xbb   : > { %v626_v13 = vrot.slane %v527_v5, 7  ;;  %v755_v14 = vrot.slane %v527_v5, 1  ;;  %v2666_v16 = vpack.c.bf16 %v527_v5, %v526_v27  ;;  %v1341_v43 = vadd.f32 %v1309_v36, %v1210_v21 }
  0xbc   : > { %v2192_v18 = vmax.f32 %v2160_v8, 0.0  ;;  %v2193_v19 = vmax.f32 %v2161_v9, 0.0 }
  0xbd   : > { %v627_v23 = vsel %vm618_vm1, %v625_v48, %v626_v13  ;;  %v756_v24 = vsel %vm747_vm2, %v754_v58, %v755_v14  ;;  %v830_v26 = vsel %vm747_vm2, %v755_v14, 0.0  ;;  %v3267_v28 = vunpack.c.l.bf16 %v2666_v16 }
  0xbe   : > { %v2586_v29 = vpack.c.bf16 %v627_v23, %v701_v4  ;;  %v2746_v33 = vpack.c.bf16 %v830_v26, %v756_v24  ;;  %v457_v25 = vpop.f32.mrf.mxu0  ;;  %v2224_v34 = vpack.c.bf16 %v2193_v19, %v2192_v18  ;;  %v3268_v38 = vunpack.c.h.bf16 %v2666_v16 }
  0xbf   : > { %v458_v27 = vadd.f32 %v3769_v44, %v457_v25  ;;  %v1963_v47 = vmul.f32 %v3864_v20, %v3267_v28  ;;  %v1570_v49 = vmul.f32 %v3830_v40, %v3267_v28  ;;  %v1179_v52 = vmul.f32 %v3794_v0, %v3267_v28 }
  0xc0   : > { %2299 = vmatmul.bf16.vlgmr.msra.gmra.mxu1 %v2224_v34  ;;  %v3203_v31 = vunpack.c.l.bf16 %v2586_v29  ;;  %v3204_v41 = vunpack.c.h.bf16 %v2586_v29  ;;  %v3331_v42 = vunpack.c.l.bf16 %v2746_v33  ;;  %v3332_v48 = vunpack.c.h.bf16 %v2746_v33 }
  0xc1   : > { %v528_v46 = vmax.f32 %v458_v27, 0.0  ;;  %v1964_v53 = vmul.f32 %v3864_v20, %v3268_v38  ;;  %v1571_v55 = vmul.f32 %v3830_v40, %v3268_v38  ;;  %v1180_v57 = vmul.f32 %v3794_v0, %v3268_v38 }
  0xc2   : > { %v1831_v50 = vmul.f32 %v3855_v12, %v3203_v31  ;;  %v1832_v35 = vmul.f32 %v3855_v12, %v3204_v41  ;;  %v1439_v51 = vmul.f32 %v3821_v30, %v3203_v31  ;;  %v1440_v54 = vmul.f32 %v3821_v30, %v3204_v41 }
  0xc3   : > { %v2095_v61 = vmul.f32 %v3870_v32, %v3331_v42  ;;  %v628_v63 = vrot.slane %v528_v46, 7  ;;  %v2096_v1 = vmul.f32 %v3870_v32, %v3332_v48  ;;  %v1048_v3 = vmul.f32 %v3785_v59, %v3203_v31 }
  0xc4   : > { %v1863_v58 = vadd.f32 %v1831_v50, %v1731_v17  ;;  %v1864_v60 = vadd.f32 %v1832_v35, %v1732_v37  ;;  %v1471_v62 = vadd.f32 %v1439_v51, %v1340_v39  ;;  %v1472_v2 = vadd.f32 %v1440_v54, %v1341_v43 }
  0xc5   : > { %v1049_v8 = vmul.f32 %v3785_v59, %v3204_v41  ;;  %v757_v9 = vrot.slane %v528_v46, 1  ;;  %v1701_v13 = vmul.f32 %v3836_v45, %v3331_v42  ;;  %v1211_v17 = vadd.f32 %v1179_v52, %v1048_v3 }
  0xc6   : > { %v459_v4 = vpop.f32.mrf.mxu0  ;;  %v1995_v5 = vadd.f32 %v1963_v47, %v1863_v58  ;;  %v1996_v6 = vadd.f32 %v1964_v53, %v1864_v60  ;;  %v1602_v7 = vadd.f32 %v1570_v49, %v1471_v62  ;;  %v1603_v11 = vadd.f32 %v1571_v55, %v1472_v2 }
  0xc7   : > { %v460_v10 = vadd.f32 %v3769_v44, %v459_v4  ;;  %v1212_v18 = vadd.f32 %v1180_v57, %v1049_v8  ;;  %v702_v19 = vsel %vm618_vm1, 0.0, %v628_v63  ;;  %v1702_v22 = vmul.f32 %v3836_v45, %v3332_v48 }
  0xc8   : > { %v2127_v14 = vadd.f32 %v2095_v61, %v1995_v5  ;;  %v2128_v16 = vadd.f32 %v2096_v1, %v1996_v6  ;;  %v1310_v23 = vmul.f32 %v3806_v15, %v3331_v42  ;;  %v1733_v28 = vadd.f32 %v1701_v13, %v1602_v7 }
  0xc9   : > { %v529_v21 = vmax.f32 %v460_v10, 0.0  ;;  %v1311_v29 = vmul.f32 %v3806_v15, %v3332_v48  ;;  %v1734_v36 = vadd.f32 %v1702_v22, %v1603_v11 }
  0xca   : > { %v2162_v24 = vadd.f32 %v3886_v56, %v2127_v14  ;;  %v2163_v26 = vadd.f32 %v3886_v56, %v2128_v16  ;;  %v1342_v38 = vadd.f32 %v1310_v23, %v1211_v17  ;;  %v487_v16 = vpop.f32.mrf.mxu3 }
  0xcb   : > { %v629_v33 = vrot.slane %v529_v21, 7  ;;  %v758_v25 = vrot.slane %v529_v21, 1  ;;  %v2671_v34 = vpack.c.bf16 %v529_v21, %v528_v46  ;;  %v1343_v39 = vadd.f32 %v1311_v29, %v1212_v18 }
  0xcc   : > { %v2194_v27 = vmax.f32 %v2162_v24, 0.0  ;;  %v2195_v37 = vmax.f32 %v2163_v26, 0.0  ;;  %v488_v24 = vadd.f32 %v3769_v44, %v487_v16 }
  0xcd   : > { %v630_v31 = vsel %vm618_vm1, %v628_v63, %v629_v33  ;;  %v759_v41 = vsel %vm747_vm2, %v757_v9, %v758_v25  ;;  %v831_v42 = vsel %vm747_vm2, %v758_v25, 0.0  ;;  %v3271_v43 = vunpack.c.l.bf16 %v2671_v34 }
  0xce   : > { %v2591_v47 = vpack.c.bf16 %v630_v31, %v702_v19  ;;  %v2751_v49 = vpack.c.bf16 %v831_v42, %v759_v41  ;;  %v462_v50 = vpop.f32.mrf.mxu0  ;;  %v2225_v35 = vpack.c.bf16 %v2195_v37, %v2194_v27  ;;  %v3272_v48 = vunpack.c.h.bf16 %v2671_v34 }
  0xcf   : > { %v463_v51 = vadd.f32 %v3769_v44, %v462_v50  ;;  %v1965_v46 = vmul.f32 %v3864_v20, %v3271_v43  ;;  %v1572_v52 = vmul.f32 %v3830_v40, %v3271_v43  ;;  %v1181_v53 = vmul.f32 %v3794_v0, %v3271_v43 }
  0xd0   : > { %2304 = vmatmul.bf16.gmra.mxu1 %v2225_v35  ;;  %v3207_v54 = vunpack.c.l.bf16 %v2591_v47  ;;  %v3208_v55 = vunpack.c.h.bf16 %v2591_v47  ;;  %v1966_v57 = vmul.f32 %v3864_v20, %v3272_v48  ;;  %v3335_v58 = vunpack.c.l.bf16 %v2751_v49 }
  0xd1   : > { %v530_v60 = vmax.f32 %v463_v51, 0.0  ;;  %v3336_v61 = vunpack.c.h.bf16 %v2751_v49  ;;  %v1573_v62 = vmul.f32 %v3830_v40, %v3272_v48  ;;  %v1182_v63 = vmul.f32 %v3794_v0, %v3272_v48 }
  0xd2   : > { %v1833_v1 = vmul.f32 %v3855_v12, %v3207_v54  ;;  %v1834_v2 = vmul.f32 %v3855_v12, %v3208_v55  ;;  %v2097_v3 = vmul.f32 %v3870_v32, %v3335_v58  ;;  %v1441_v4 = vmul.f32 %v3821_v30, %v3207_v54 }
  0xd3   : > { %v631_v5 = vrot.slane %v530_v60, 7  ;;  %v760_v6 = vrot.slane %v530_v60, 1  ;;  %v2098_v7 = vmul.f32 %v3870_v32, %v3336_v61  ;;  %v1442_v8 = vmul.f32 %v3821_v30, %v3208_v55 }
  0xd4   : > { %v1865_v9 = vadd.f32 %v1833_v1, %v1733_v28  ;;  %v1866_v10 = vadd.f32 %v1834_v2, %v1734_v36  ;;  %v1473_v11 = vadd.f32 %v1441_v4, %v1342_v38  ;;  %v1703_v13 = vmul.f32 %v3836_v45, %v3335_v58 }
  0xd5   : > { %v703_v14 = vsel %vm618_vm1, 0.0, %v631_v5  ;;  %v1474_v17 = vadd.f32 %v1442_v8, %v1343_v39  ;;  %v1704_v18 = vmul.f32 %v3836_v45, %v3336_v61  ;;  %v1050_v19 = vmul.f32 %v3785_v59, %v3207_v54 }
  0xd6   : > { %v464_v21 = vpop.f32.mrf.mxu0  ;;  %v1997_v22 = vadd.f32 %v1965_v46, %v1865_v9  ;;  %v1998_v23 = vadd.f32 %v1966_v57, %v1866_v10  ;;  %v1604_v26 = vadd.f32 %v1572_v52, %v1473_v11  ;;  %v1051_v33 = vmul.f32 %v3785_v59, %v3208_v55 }
  0xd7   : > { %v465_v28 = vadd.f32 %v3769_v44, %v464_v21  ;;  %v1605_v29 = vadd.f32 %v1573_v62, %v1474_v17  ;;  %v1213_v25 = vadd.f32 %v1181_v53, %v1050_v19  ;;  %v3949_v27 = vmax.f32 %v488_v24, 0.0 }
  0xd8   : > { %v2129_v34 = vadd.f32 %v2097_v3, %v1997_v22  ;;  %v2130_v36 = vadd.f32 %v2098_v7, %v1998_v23  ;;  %v1735_v37 = vadd.f32 %v1703_v13, %v1604_v26  ;;  %v1214_v31 = vadd.f32 %v1182_v63, %v1051_v33 }
  0xd9   : > { %v531_v38 = vmax.f32 %v465_v28, 0.0  ;;  %v1736_v39 = vadd.f32 %v1704_v18, %v1605_v29  ;;  %v1312_v41 = vmul.f32 %v3806_v15, %v3335_v58  ;;  %v646_v47 = vrot.slane %v3949_v27, 7 }
  0xda   : > { %v2164_v42 = vadd.f32 %v3886_v56, %v2129_v34  ;;  %v2165_v43 = vadd.f32 %v3886_v56, %v2130_v36  ;;  %v775_v49 = vrot.slane %v3949_v27, 1  ;;  %v1313_v51 = vmul.f32 %v3806_v15, %v3336_v61 }
  0xdb   : > { %v632_v50 = vrot.slane %v531_v38, 7  ;;  %v761_v35 = vrot.slane %v531_v38, 1  ;;  %v2676_v48 = vpack.c.bf16 %v531_v38, %v530_v60  ;;  %v708_v53 = vsel %vm618_vm1, 0.0, %v646_v47 }
  0xdc   : > { %v2196_v46 = vmax.f32 %v2164_v42, 0.0  ;;  %v2197_v52 = vmax.f32 %v2165_v43, 0.0  ;;  %v1344_v54 = vadd.f32 %v1312_v41, %v1213_v25  ;;  %v1345_v7 = vadd.f32 %v1313_v51, %v1214_v31 }
  0xdd   : > { %v633_v55 = vsel %vm618_vm1, %v631_v5, %v632_v50  ;;  %v762_v57 = vsel %vm747_vm2, %v760_v6, %v761_v35  ;;  %v832_v58 = vsel %vm747_vm2, %v761_v35, 0.0  ;;  %v3275_v62 = vunpack.c.l.bf16 %v2676_v48 }
  0xde   : > { %v2596_v63 = vpack.c.bf16 %v633_v55, %v703_v14  ;;  %v2756_v1 = vpack.c.bf16 %v832_v58, %v762_v57  ;;  %v467_v2 = vpop.f32.mrf.mxu0  ;;  %v2226_v3 = vpack.c.bf16 %v2197_v52, %v2196_v46  ;;  %v3961_v4 = vunpack.c.h.bf16 %v2676_v48  ;;  %v489_v14 = vpop.f32.mrf.mxu3 }
  0xdf   : > { %v468_v60 = vadd.f32 %v3769_v44, %v467_v2  ;;  %v1967_v61 = vmul.f32 %v3864_v20, %v3275_v62  ;;  %v1574_v8 = vmul.f32 %v3830_v40, %v3275_v62  ;;  %v3979_v17 = vmul.f32 %v3794_v0, %v3275_v62 }
  0xe0   : > { %2309 = vmatmul.bf16.gmra.mxu1 %v2226_v3  ;;  %v3966_v5 = vunpack.c.l.bf16 %v2596_v63  ;;  %v3968_v6 = vunpack.c.h.bf16 %v2596_v63  ;;  %v1968_v9 = vmul.f32 %v3864_v20, %v3961_v4  ;;  %v3972_v10 = vunpack.c.l.bf16 %v2756_v1 }
  0xe1   : > { %v532_v11 = vmax.f32 %v468_v60, 0.0  ;;  %v3974_v13 = vunpack.c.h.bf16 %v2756_v1  ;;  %v1575_v16 = vmul.f32 %v3830_v40, %v3961_v4  ;;  %v490_v22 = vadd.f32 %v3769_v44, %v489_v14 }
  0xe2   : > { %v1835_v18 = vmul.f32 %v3855_v12, %v3966_v5  ;;  %v1836_v19 = vmul.f32 %v3855_v12, %v3968_v6  ;;  %v2099_v21 = vmul.f32 %v3870_v32, %v3972_v10  ;;  %v1443_v28 = vmul.f32 %v3821_v30, %v3966_v5 }
  0xe3   : > { %v634_v23 = vrot.slane %v532_v11, 7  ;;  %v763_v24 = vrot.slane %v532_v11, 1  ;;  %v2100_v26 = vmul.f32 %v3870_v32, %v3974_v13  ;;  %v541_v25 = vmax.f32 %v490_v22, 0.0 }
  0xe4   : > { %v1867_v29 = vadd.f32 %v1835_v18, %v1735_v37  ;;  %v1868_v33 = vadd.f32 %v1836_v19, %v1736_v39  ;;  %v1444_v34 = vmul.f32 %v3821_v30, %v3968_v6  ;;  %v1475_v38 = vadd.f32 %v1443_v28, %v1344_v54 }
  0xe5   : > { %v704_v36 = vsel %vm618_vm1, 0.0, %v634_v23  ;;  %v1705_v31 = vmul.f32 %v3836_v45, %v3972_v10  ;;  %v1706_v41 = vmul.f32 %v3836_v45, %v3974_v13  ;;  %v647_v35 = vrot.slane %v541_v25, 7 }
  0xe6   : > { %v469_v42 = vpop.f32.mrf.mxu0  ;;  %v1999_v43 = vadd.f32 %v1967_v61, %v1867_v29  ;;  %v2000_v50 = vadd.f32 %v1968_v9, %v1868_v33  ;;  %v776_v48 = vrot.slane %v541_v25, 1  ;;  %v4001_v39 = vpack.c.bf16 %v541_v25, %v3949_v27  ;;  %v492_v1 = vpop.f32.mrf.mxu3 }
  0xe7   : > { %v470_v37 = vadd.f32 %v3769_v44, %v469_v42  ;;  %v1476_v51 = vadd.f32 %v1444_v34, %v1345_v7  ;;  %v1606_v46 = vadd.f32 %v1574_v8, %v1475_v38  ;;  %v648_v55 = vsel %vm618_vm1, %v646_v47, %v647_v35 }
  0xe8   : > { %v2131_v52 = vadd.f32 %v2099_v21, %v1999_v43  ;;  %v2132_v54 = vadd.f32 %v2100_v26, %v2000_v50  ;;  %v777_v57 = vsel %vm747_vm2, %v775_v49, %v776_v48  ;;  %v837_v62 = vsel %vm747_vm2, %v776_v48, 0.0  ;;  %3412 = vst [vmem:[#allocation2 + $0xe0] sm:$0xff] %v4001_v39  }
  0xe9   : > { %v533_v58 = vmax.f32 %v470_v37, 0.0  ;;  %v4006_v63 = vpack.c.bf16 %v648_v55, %v708_v53  ;;  %v1607_v2 = vadd.f32 %v1575_v16, %v1476_v51  ;;  %v4011_v60 = vpack.c.bf16 %v837_v62, %v777_v57 }
  0xea   : > { %v2166_v27 = vadd.f32 %v3886_v56, %v2131_v52  ;;  %v2167_v3 = vadd.f32 %v3886_v56, %v2132_v54  ;;  %v493_v61 = vadd.f32 %v3769_v44, %v492_v1  ;;  %v1737_v8 = vadd.f32 %v1705_v31, %v1606_v46 }
  0xeb   : > { %v635_v47 = vrot.slane %v533_v58, 7  ;;  %v764_v7 = vrot.slane %v533_v58, 1  ;;  %v2681_v49 = vpack.c.bf16 %v533_v58, %v532_v11  ;;  %3397 = vst [vmem:[#allocation2 + $0x50] sm:$0xff] %v4006_v63   ;;  %v1738_v16 = vadd.f32 %v1706_v41, %v1607_v2 }
  0xec   : > { %v2198_v53 = vmax.f32 %v2166_v27, 0.0  ;;  %v2199_v9 = vmax.f32 %v2167_v3, 0.0  ;;  %3427 = vst [vmem:[#allocation2 + $0x170] sm:$0xff] %v4011_v60   ;;  %v542_v14 = vmax.f32 %v493_v61, 0.0  ;;  %v1052_v48 = vmul.f32 %v3785_v59, %v3966_v5 }
  0xed   : > { %v636_v18 = vsel %vm618_vm1, %v634_v23, %v635_v47  ;;  %v765_v19 = vsel %vm747_vm2, %v763_v24, %v764_v7  ;;  %v833_v21 = vsel %vm747_vm2, %v764_v7, 0.0  ;;  %v4019_v22 = vunpack.c.l.bf16 %v2681_v49 }
  0xee   : > { %v2601_v26 = vpack.c.bf16 %v636_v18, %v704_v36  ;;  %v2761_v28 = vpack.c.bf16 %v833_v21, %v765_v19  ;;  %v472_v11 = vpop.f32.mrf.mxu0  ;;  %v2227_v29 = vpack.c.bf16 %v2199_v9, %v2198_v53  ;;  %v649_v33 = vrot.slane %v542_v14, 7  ;;  %v494_v35 = vpop.f32.mrf.mxu3 }
  0xef   : > { %v473_v25 = vadd.f32 %v3769_v44, %v472_v11  ;;  %v778_v34 = vrot.slane %v542_v14, 1  ;;  %v4022_v38 = vunpack.c.h.bf16 %v2681_v49  ;;  %v1969_v31 = vmul.f32 %v3864_v20, %v4019_v22 }
  0xf0   : > { %2314 = vmatmul.bf16.gmra.mxu1 %v2227_v29  ;;  %v709_v23 = vsel %vm618_vm1, 0.0, %v649_v33  ;;  %v4027_v24 = vunpack.c.l.bf16 %v2601_v26  ;;  %v4029_v41 = vunpack.c.h.bf16 %v2601_v26  ;;  %v4031_v36 = vunpack.c.l.bf16 %v2761_v28 }
  0xf1   : > { %v534_v42 = vmax.f32 %v473_v25, 0.0  ;;  %v1970_v43 = vmul.f32 %v3864_v20, %v4022_v38  ;;  %v4035_v50 = vunpack.c.h.bf16 %v2761_v28  ;;  %v495_v52 = vadd.f32 %v3769_v44, %v494_v35 }
  0xf2   : > { %v1837_v37 = vmul.f32 %v3855_v12, %v4027_v24  ;;  %v1838_v51 = vmul.f32 %v3855_v12, %v4029_v41  ;;  %v2101_v46 = vmul.f32 %v3870_v32, %v4031_v36  ;;  %v1053_v58 = vmul.f32 %v3785_v59, %v3968_v6 }
  0xf3   : > { %v637_v54 = vrot.slane %v534_v42, 7  ;;  %v766_v55 = vrot.slane %v534_v42, 1  ;;  %v2102_v57 = vmul.f32 %v3870_v32, %v4035_v50  ;;  %v543_v1 = vmax.f32 %v495_v52, 0.0 }
  0xf4   : > { %v1869_v5 = vadd.f32 %v1837_v37, %v1737_v8  ;;  %v1870_v62 = vadd.f32 %v1838_v51, %v1738_v16  ;;  %v1184_v2 = vmul.f32 %v3794_v0, %v3961_v4  ;;  %v1215_v3 = vadd.f32 %v3979_v17, %v1052_v48 }
  0xf5   : > { %v705_v27 = vsel %vm618_vm1, 0.0, %v637_v54  ;;  %v1314_v61 = vmul.f32 %v3806_v15, %v3972_v10  ;;  %v1315_v47 = vmul.f32 %v3806_v15, %v3974_v13  ;;  %v650_v6 = vrot.slane %v543_v1, 7 }
  0xf6   : > { %v474_v7 = vpop.f32.mrf.mxu0  ;;  %v2001_v49 = vadd.f32 %v1969_v31, %v1869_v5  ;;  %v2002_v53 = vadd.f32 %v1970_v43, %v1870_v62  ;;  %v779_v8 = vrot.slane %v543_v1, 1  ;;  %v4059_v16 = vpack.c.bf16 %v543_v1, %v542_v14  ;;  %v497_v11 = vpop.f32.mrf.mxu3 }
  0xf7   : > { %v475_v9 = vadd.f32 %v3769_v44, %v474_v7  ;;  %v1216_v4 = vadd.f32 %v1184_v2, %v1053_v58  ;;  %v1346_v18 = vadd.f32 %v1314_v61, %v1215_v3  ;;  %v651_v17 = vsel %vm618_vm1, %v649_v33, %v650_v6 }
  0xf8   : > { %v2133_v19 = vadd.f32 %v2101_v46, %v2001_v49  ;;  %v2134_v21 = vadd.f32 %v2102_v57, %v2002_v53  ;;  %v780_v10 = vsel %vm747_vm2, %v778_v34, %v779_v8  ;;  %v838_v13 = vsel %vm747_vm2, %v779_v8, 0.0  ;;  %3413 = vst [vmem:[#allocation2 + $0xe8] sm:$0xff] %v4059_v16  }
  0xf9   : > { %v535_v26 = vmax.f32 %v475_v9, 0.0  ;;  %v4064_v28 = vpack.c.bf16 %v651_v17, %v709_v23  ;;  %v1347_v29 = vadd.f32 %v1315_v47, %v1216_v4  ;;  %v4069_v31 = vpack.c.bf16 %v838_v13, %v780_v10 }
  0xfa   : > { %v2168_v14 = vadd.f32 %v3886_v56, %v2133_v19  ;;  %v2169_v25 = vadd.f32 %v3886_v56, %v2134_v21  ;;  %v498_v43 = vadd.f32 %v3769_v44, %v497_v11  ;;  %v1445_v23 = vmul.f32 %v3821_v30, %v4027_v24 }
  0xfb   : > { %v638_v33 = vrot.slane %v535_v26, 7  ;;  %v767_v35 = vrot.slane %v535_v26, 1  ;;  %v2686_v34 = vpack.c.bf16 %v535_v26, %v534_v42  ;;  %3398 = vst [vmem:[#allocation2 + $0x58] sm:$0xff] %v4064_v28   ;;  %v1446_v46 = vmul.f32 %v3821_v30, %v4029_v41 }
  0xfc   : > { %v2200_v48 = vmax.f32 %v2168_v14, 0.0  ;;  %v2201_v37 = vmax.f32 %v2169_v25, 0.0  ;;  %3428 = vst [vmem:[#allocation2 + $0x178] sm:$0xff] %v4069_v31   ;;  %v4076_v51 = vmax.f32 %v498_v43, 0.0  ;;  %v1477_v58 = vadd.f32 %v1445_v23, %v1346_v18 }
  0xfd   : > { %v639_v52 = vsel %vm618_vm1, %v637_v54, %v638_v33  ;;  %v768_v57 = vsel %vm747_vm2, %v766_v55, %v767_v35  ;;  %v834_v42 = vsel %vm747_vm2, %v767_v35, 0.0  ;;  %v1478_v7 = vadd.f32 %v1446_v46, %v1347_v29  ;;  %v4123_v46 = vld [vmem:[%s4814_s2] ss:$0 sm:$0xff] }
  0xfe   : > { %v2606_v5 = vpack.c.bf16 %v639_v52, %v705_v27  ;;  %v2766_v62 = vpack.c.bf16 %v834_v42, %v768_v57  ;;  %v477_v1 = vpop.f32.mrf.mxu0  ;;  %v2228_v2 = vpack.c.bf16 %v2201_v37, %v2200_v48  ;;  %v652_v3 = vrot.slane %v4076_v51, 7  ;;  %v499_v4 = vpop.f32.mrf.mxu3 }
  0xff   : > { %v478_v61 = vadd.f32 %v3769_v44, %v477_v1  ;;  %v781_v47 = vrot.slane %v4076_v51, 1  ;;  %v1576_v49 = vmul.f32 %v3830_v40, %v4019_v22  ;;  %v1577_v55 = vmul.f32 %v3830_v40, %v4022_v38 }
 0x100   : > { %2319 = vmatmul.bf16.gmra.mxu1 %v2228_v2  ;;  %v4089_v54 = vsel %vm618_vm1, 0.0, %v652_v3  ;;  %v1707_v27 = vmul.f32 %v3836_v45, %v4031_v36  ;;  %v1708_v53 = vmul.f32 %v3836_v45, %v4035_v50  ;;  %v4097_v8 = vunpack.c.l.bf16 %v2606_v5 }
 0x101   : > { %v536_v44 = vmax.f32 %v478_v61, 0.0  ;;  %v1608_v6 = vadd.f32 %v1576_v49, %v1477_v58  ;;  %v4099_v9 = vunpack.c.h.bf16 %v2606_v5  ;;  %v1609_v18 = vadd.f32 %v1577_v55, %v1478_v7 }
 0x102   : > { %v4101_v19 = vunpack.c.l.bf16 %v2686_v34  ;;  %v4103_v21 = vunpack.c.h.bf16 %v2686_v34  ;;  %v4105_v17 = vunpack.c.l.bf16 %v2766_v62  ;;  %v1839_v11 = vmul.f32 %v3855_v12, %v4097_v8 }
 0x103   : > { %v640_v10 = vrot.slane %v536_v44, 7  ;;  %v769_v26 = vrot.slane %v536_v44, 1  ;;  %v1739_v13 = vadd.f32 %v1707_v27, %v1608_v6  ;;  %v1740_v29 = vadd.f32 %v1708_v53, %v1609_v18 }
 0x104   : > { %v1840_v14 = vmul.f32 %v3855_v12, %v4099_v9  ;;  %v1971_v25 = vmul.f32 %v3864_v20, %v4101_v19  ;;  %v1972_v43 = vmul.f32 %v3864_v20, %v4103_v21  ;;  %v4116_v34 = vunpack.c.h.bf16 %v2766_v62 }
 0x105   : > { %v706_v33 = vsel %vm618_vm1, 0.0, %v640_v10  ;;  %v1871_v35 = vadd.f32 %v1839_v11, %v1739_v13  ;;  %v2103_v23 = vmul.f32 %v3870_v32, %v4105_v17  ;;  %v500_v52 = vadd.f32 %v4123_v46, %v499_v4 }
 0x106   : > { %v479_v48 = vpop.f32.mrf.mxu0  ;;  %v1872_v37 = vadd.f32 %v1840_v14, %v1740_v29  ;;  %v1054_v57 = vmul.f32 %v3785_v59, %v4027_v24  ;;  %v1055_v42 = vmul.f32 %v3785_v59, %v4029_v41  ;;  %v2104_v62 = vmul.f32 %v3870_v32, %v4116_v34  ;;  %v502_v59 = vpop.f32.mrf.mxu3 }
 0x107   : > { %v480_v58 = vadd.f32 %v4123_v46, %v479_v48  ;;  %v2003_v5 = vadd.f32 %v1971_v25, %v1871_v35  ;;  %v1185_v1 = vmul.f32 %v3794_v0, %v4019_v22  ;;  %v545_v61 = vmax.f32 %v500_v52, 0.0 }
 0x108   : > { %v2004_v2 = vadd.f32 %v1972_v43, %v1872_v37  ;;  %v1186_v7 = vmul.f32 %v3794_v0, %v4022_v38  ;;  %v1316_v24 = vmul.f32 %v3806_v15, %v4031_v36  ;;  %v1317_v27 = vmul.f32 %v3806_v15, %v4035_v50 }
 0x109   : > { %v537_v49 = vmax.f32 %v480_v58, 0.0  ;;  %v2135_v55 = vadd.f32 %v2103_v23, %v2003_v5  ;;  %v1217_v41 = vadd.f32 %v1185_v1, %v1054_v57  ;;  %v653_v6 = vrot.slane %v545_v61, 7 }
 0x10a   : > { %v2136_v53 = vadd.f32 %v2104_v62, %v2004_v2  ;;  %v782_v4 = vrot.slane %v545_v61, 1  ;;  %v4142_v22 = vpack.c.bf16 %v545_v61, %v4076_v51  ;;  %v503_v37 = vadd.f32 %v4123_v46, %v502_v59 }
 0x10b   : > { %v641_v18 = vrot.slane %v537_v49, 7  ;;  %v770_v13 = vrot.slane %v537_v49, 1  ;;  %v2691_v11 = vpack.c.bf16 %v537_v49, %v536_v44  ;;  %v2170_v0 = vadd.f32 %v3886_v56, %v2135_v55 }
 0x10c   : > { %v2171_v38 = vadd.f32 %v3886_v56, %v2136_v53  ;;  %v654_v36 = vsel %vm618_vm1, %v652_v3, %v653_v6  ;;  %v783_v29 = vsel %vm747_vm2, %v781_v47, %v782_v4  ;;  %v839_v14 = vsel %vm747_vm2, %v782_v4, 0.0  ;;  %3414 = vst [vmem:[#allocation2 + $0xf0] sm:$0xff] %v4142_v22  }
 0x10d   : > { %v642_v15 = vsel %vm618_vm1, %v640_v10, %v641_v18  ;;  %v771_v50 = vsel %vm747_vm2, %v769_v26, %v770_v13  ;;  %v835_v51 = vsel %vm747_vm2, %v770_v13, 0.0  ;;  %v2202_v25 = vmax.f32 %v2170_v0, 0.0 }
 0x10e   : > { %v2611_v44 = vpack.c.bf16 %v642_v15, %v706_v33  ;;  %v2771_v43 = vpack.c.bf16 %v835_v51, %v771_v50  ;;  %v482_v35 = vpop.f32.mrf.mxu0  ;;  %v2203_v23 = vmax.f32 %v2171_v38, 0.0  ;;  %v4154_v48 = vpack.c.bf16 %v654_v36, %v4089_v54  ;;  %v504_v1 = vpop.f32.mrf.mxu3 }
 0x10f   : > { %v483_v3 = vadd.f32 %v4123_v46, %v482_v35  ;;  %v4157_v47 = vpack.c.bf16 %v839_v14, %v783_v29  ;;  %v1218_v52 = vadd.f32 %v1186_v7, %v1055_v42  ;;  %v1348_v57 = vadd.f32 %v1316_v24, %v1217_v41 }
 0x110   : > { %v2229_v10 = vpack.c.bf16 %v2203_v23, %v2202_v25  ;;  %v1447_v26 = vmul.f32 %v3821_v30, %v4097_v8  ;;  %v1448_v33 = vmul.f32 %v3821_v30, %v4099_v9  ;;  %v4164_v5 = vmax.f32 %v503_v37, 0.0  ;;  %3399 = vst [vmem:[#allocation2 + $0x60] sm:$0xff] %v4154_v48  }
 0x111   : > { %v538_v58 = vmax.f32 %v483_v3, 0.0  ;;  %v1349_v54 = vadd.f32 %v1317_v27, %v1218_v52  ;;  %v1578_v62 = vmul.f32 %v3830_v40, %v4101_v19  ;;  %v1579_v2 = vmul.f32 %v3830_v40, %v4103_v21  ;;  %3429 = vst [vmem:[#allocation2 + $0x180] sm:$0xff] %v4157_v47  }
 0x112   : > { %2324 = vmatmul.bf16.gmra.mxu1 %v2229_v10  ;;  %v1479_v42 = vadd.f32 %v1447_v26, %v1348_v57  ;;  %v1709_v61 = vmul.f32 %v3836_v45, %v4105_v17  ;;  %v4173_v7 = vunpack.c.l.bf16 %v2611_v44  ;;  %v655_v49 = vrot.slane %v4164_v5, 7 }
 0x113   : > { %v643_v30 = vrot.slane %v538_v58, 7  ;;  %v772_v24 = vrot.slane %v538_v58, 1  ;;  %v784_v55 = vrot.slane %v4164_v5, 1  ;;  %v1480_v59 = vadd.f32 %v1448_v33, %v1349_v54 }
 0x114   : > { %v1610_v41 = vadd.f32 %v1578_v62, %v1479_v42  ;;  %v1710_v27 = vmul.f32 %v3836_v45, %v4116_v34  ;;  %v4180_v53 = vunpack.c.h.bf16 %v2611_v44  ;;  %v711_v6 = vsel %vm618_vm1, 0.0, %v655_v49 }
 0x115   : > { %v707_v40 = vsel %vm618_vm1, 0.0, %v643_v30  ;;  %v1841_v4 = vmul.f32 %v3855_v12, %v4173_v7  ;;  %v4186_v18 = vunpack.c.l.bf16 %v2691_v11  ;;  %v1611_v0 = vadd.f32 %v1579_v2, %v1480_v59 }
 0x116   : > { %v484_v13 = vpop.f32.mrf.mxu0  ;;  %v1741_v38 = vadd.f32 %v1709_v61, %v1610_v41  ;;  %v1842_v36 = vmul.f32 %v3855_v12, %v4180_v53  ;;  %v4190_v29 = vunpack.c.h.bf16 %v2691_v11  ;;  %v4195_v15 = vunpack.c.l.bf16 %v2771_v43  ;;  %v507_v3 = vpop.f32.mrf.mxu3 }
 0x117   : > { %v485_v45 = vadd.f32 %v4123_v46, %v484_v13  ;;  %v1973_v14 = vmul.f32 %v3864_v20, %v4186_v18  ;;  %v4197_v50 = vunpack.c.h.bf16 %v2771_v43  ;;  %v1742_v51 = vadd.f32 %v1710_v27, %v1611_v0  ;;  %v4209_v43 = vld [vmem:[%s4815_s3] ss:$0 sm:$0xff] }
 0x118   : > { %v1873_v25 = vadd.f32 %v1841_v4, %v1741_v38  ;;  %v1974_v44 = vmul.f32 %v3864_v20, %v4190_v29  ;;  %v505_v35 = vadd.f32 %v4123_v46, %v504_v1  ;;  %v2105_v12 = vmul.f32 %v3870_v32, %v4195_v15 }
 0x119   : > { %v539_v23 = vmax.f32 %v485_v45, 0.0  ;;  %v2106_v11 = vmul.f32 %v3870_v32, %v4197_v50  ;;  %v1056_v37 = vmul.f32 %v4209_v43, %v4097_v8  ;;  %v1874_v52 = vadd.f32 %v1842_v36, %v1742_v51 }
 0x11a   : > { %v2005_v20 = vadd.f32 %v1973_v14, %v1873_v25  ;;  %v547_v10 = vmax.f32 %v505_v35, 0.0  ;;  %v508_v57 = vadd.f32 %v4123_v46, %v507_v3  ;;  %v1057_v32 = vmul.f32 %v4209_v43, %v4099_v9  ;;  %v4249_v25 = vld [vmem:[%s4815_s3 + $0x2] ss:$0 sm:$0xff]  ;;  %v4271_v3 = vld [vmem:[%s4815_s3 + $0x4] ss:$0 sm:$0xff] }
 0x11b   : > { %v644_v26 = vrot.slane %v539_v23, 7  ;;  %v773_v33 = vrot.slane %v539_v23, 1  ;;  %v2696_v54 = vpack.c.bf16 %v539_v23, %v538_v58  ;;  %v2006_v62 = vadd.f32 %v1974_v44, %v1874_v52 }
 0x11c   : > { %v2137_v1 = vadd.f32 %v2105_v12, %v2005_v20  ;;  %v656_v42 = vrot.slane %v547_v10, 7  ;;  %v785_v2 = vrot.slane %v547_v10, 1  ;;  %v4220_v41 = vpack.c.bf16 %v547_v10, %v4164_v5 }
 0x11d   : > { %v645_v61 = vsel %vm618_vm1, %v643_v30, %v644_v26  ;;  %v774_v59 = vsel %vm747_vm2, %v772_v24, %v773_v33  ;;  %v836_v8 = vsel %vm747_vm2, %v773_v33, 0.0  ;;  %v2138_v13 = vadd.f32 %v2106_v11, %v2006_v62 }
 0x11e   : > { %v2616_v27 = vpack.c.bf16 %v645_v61, %v707_v40  ;;  %v2776_v4 = vpack.c.bf16 %v836_v8, %v774_v59  ;;  %v2172_v58 = vadd.f32 %v3886_v56, %v2137_v1  ;;  %v657_v9 = vsel %vm618_vm1, %v655_v49, %v656_v42  ;;  %3415 = vst [vmem:[#allocation2 + $0xf8] sm:$0xff] %v4220_v41   ;;  %v4239_v49 = vld [vmem:[%s4815_s3 + $0x1] ss:$0 sm:$0xff]  ;;  %v509_v51 = vpop.f32.mrf.mxu3  ;;  %v4299_v8 = vld [vmem:[%s4815_s3 + $0x6] ss:$0 sm:$0xff] }
 0x11f   : > { %v786_v0 = vsel %vm747_vm2, %v784_v55, %v785_v2  ;;  %v840_v38 = vsel %vm747_vm2, %v785_v2, 0.0  ;;  %v4227_v30 = vmax.f32 %v508_v57, 0.0  ;;  %v2173_v24 = vadd.f32 %v3886_v56, %v2138_v13 }
 0x120   : > { %v2204_v36 = vmax.f32 %v2172_v58, 0.0  ;;  %v4230_v5 = vpack.c.bf16 %v657_v9, %v711_v6  ;;  %v4232_v40 = vpack.c.bf16 %v840_v38, %v786_v0  ;;  %v1187_v55 = vmul.f32 %v4239_v49, %v4101_v19  ;;  %v4258_v19 = vld [vmem:[%s4815_s3 + $0x3] ss:$0 sm:$0xff]  ;;  %v4319_v38 = vld [vmem:[%s4815_s3 + $0x8] ss:$0 sm:$0xff] }
 0x121   : > { %v658_v45 = vrot.slane %v4227_v30, 7  ;;  %v787_v14 = vrot.slane %v4227_v30, 1  ;;  %v1188_v56 = vmul.f32 %v4239_v49, %v4103_v21  ;;  %v2205_v6 = vmax.f32 %v2173_v24, 0.0 }
 0x122   : > { %3400 = vst [vmem:[#allocation2 + $0x68] sm:$0xff] %v4230_v5   ;;  %v1318_v44 = vmul.f32 %v4249_v25, %v4105_v17  ;;  %v1319_v35 = vmul.f32 %v4249_v25, %v4116_v34  ;;  %v1449_v21 = vmul.f32 %v4258_v19, %v4173_v7  ;;  %v1219_v12 = vadd.f32 %v1187_v55, %v1056_v37  ;;  %v4280_v37 = vld [vmem:[%s4815_s3 + $0x5] ss:$0 sm:$0xff] }
 0x123   : > { %3430 = vst [vmem:[#allocation2 + $0x188] sm:$0xff] %v4232_v40   ;;  %v712_v23 = vsel %vm618_vm1, 0.0, %v658_v45  ;;  %v1220_v11 = vadd.f32 %v1188_v56, %v1057_v32  ;;  %v1450_v17 = vmul.f32 %v4258_v19, %v4180_v53  ;;  %v2230_v34 = vpack.c.bf16 %v2205_v6, %v2204_v36 }
 0x124   : > { %v1580_v52 = vmul.f32 %v4271_v3, %v4186_v18  ;;  %v1581_v20 = vmul.f32 %v4271_v3, %v4190_v29  ;;  %v1711_v10 = vmul.f32 %v4280_v37, %v4195_v15  ;;  %v1350_v57 = vadd.f32 %v1318_v44, %v1219_v12 }
 0x125   : > { %v1351_v26 = vadd.f32 %v1319_v35, %v1220_v11  ;;  %v1712_v33 = vmul.f32 %v4280_v37, %v4197_v50  ;;  %v4286_v32 = vunpack.c.l.bf16 %v2616_v27  ;;  %2329 = vmatmul.bf16.gmra.mxu1 %v2230_v34  ;;  %v4288_v62 = vunpack.c.h.bf16 %v2616_v27 }
 0x126   : > { %v4290_v1 = vunpack.c.l.bf16 %v2696_v54  ;;  %v4292_v42 = vunpack.c.h.bf16 %v2696_v54  ;;  %v4294_v2 = vunpack.c.l.bf16 %v2776_v4  ;;  %v1481_v61 = vadd.f32 %v1449_v21, %v1350_v57  ;;  %v4310_v54 = vld [vmem:[%s4815_s3 + $0x7] ss:$0 sm:$0xff]  ;;  %v512_v6 = vpop.f32.mrf.mxu3 }
 0x127   : > { %v1482_v59 = vadd.f32 %v1450_v17, %v1351_v26  ;;  %v1843_v13 = vmul.f32 %v4299_v8, %v4286_v32  ;;  %v4303_v58 = vunpack.c.h.bf16 %v2776_v4  ;;  %v1844_v27 = vmul.f32 %v4299_v8, %v4288_v62 }
 0x128   : > { %v1975_v9 = vmul.f32 %v4310_v54, %v4290_v1  ;;  %v1976_v0 = vmul.f32 %v4310_v54, %v4292_v42  ;;  %v2107_v4 = vmul.f32 %v4319_v38, %v4294_v2  ;;  %v1612_v24 = vadd.f32 %v1580_v52, %v1481_v61 }
 0x129   : > { %v1613_v36 = vadd.f32 %v1581_v20, %v1482_v59  ;;  %v2108_v55 = vmul.f32 %v4319_v38, %v4303_v58  ;;  %v510_v56 = vadd.f32 %v4123_v46, %v509_v51  ;;  %v1058_v44 = vmul.f32 %v4209_v43, %v4173_v7 }
 0x12a   : > { %v1059_v35 = vmul.f32 %v4209_v43, %v4180_v53  ;;  %v1189_v21 = vmul.f32 %v4239_v49, %v4186_v18  ;;  %v1190_v12 = vmul.f32 %v4239_v49, %v4190_v29  ;;  %v1743_v11 = vadd.f32 %v1711_v10, %v1612_v24 }
 0x12b   : > { %v1744_v17 = vadd.f32 %v1712_v33, %v1613_v36  ;;  %v549_v34 = vmax.f32 %v510_v56, 0.0  ;;  %v1320_v52 = vmul.f32 %v4249_v25, %v4195_v15  ;;  %v1321_v7 = vmul.f32 %v4249_v25, %v4197_v50 }
 0x12c   : > { %v1221_v51 = vadd.f32 %v1189_v21, %v1058_v44  ;;  %v1222_v20 = vadd.f32 %v1190_v12, %v1059_v35  ;;  %v1451_v53 = vmul.f32 %v4258_v19, %v4286_v32  ;;  %v1875_v57 = vadd.f32 %v1843_v13, %v1743_v11 }
 0x12d   : > { %v1876_v26 = vadd.f32 %v1844_v27, %v1744_v17  ;;  %v659_v18 = vrot.slane %v549_v34, 7  ;;  %v788_v61 = vrot.slane %v549_v34, 1  ;;  %v4341_v29 = vpack.c.bf16 %v549_v34, %v4227_v30 }
 0x12e   : > { %v1352_v10 = vadd.f32 %v1320_v52, %v1221_v51  ;;  %v1353_v33 = vadd.f32 %v1321_v7, %v1222_v20  ;;  %v1452_v15 = vmul.f32 %v4258_v19, %v4288_v62  ;;  %v2007_v59 = vadd.f32 %v1975_v9, %v1875_v57 }
 0x12f   : > { %v2008_v24 = vadd.f32 %v1976_v0, %v1876_v26  ;;  %v660_v50 = vsel %vm618_vm1, %v658_v45, %v659_v18  ;;  %v789_v13 = vsel %vm747_vm2, %v787_v14, %v788_v61  ;;  %v841_v27 = vsel %vm747_vm2, %v788_v61, 0.0  ;;  %v514_v0 = vpop.f32.mrf.mxu3 }
 0x130   : > { %v4352_v36 = vpack.c.bf16 %v660_v50, %v712_v23  ;;  %v1483_v56 = vadd.f32 %v1451_v53, %v1352_v10  ;;  %v1484_v44 = vadd.f32 %v1452_v15, %v1353_v33  ;;  %v2139_v35 = vadd.f32 %v2107_v4, %v2007_v59  ;;  %v4368_v4 = vld [vmem:[%s4816_s4] ss:$0 sm:$0xff] }
 0x131   : > { %v2140_v21 = vadd.f32 %v2108_v55, %v2008_v24  ;;  %v4354_v12 = vpack.c.bf16 %v841_v27, %v789_v13  ;;  %v1582_v9 = vmul.f32 %v4271_v3, %v4290_v1  ;;  %v1583_v45 = vmul.f32 %v4271_v3, %v4292_v42 }
 0x132   : > { %v1713_v30 = vmul.f32 %v4280_v37, %v4294_v2  ;;  %v1714_v14 = vmul.f32 %v4280_v37, %v4303_v58  ;;  %v3231_v23 = vunpack.c.l.bf16 %v4006_v63  ;;  %v2174_v55 = vadd.f32 %v4368_v4, %v2139_v35 }
 0x133   : > { %v2175_v11 = vadd.f32 %v4368_v4, %v2140_v21  ;;  %v1614_v17 = vadd.f32 %v1582_v9, %v1483_v56  ;;  %v3232_v34 = vunpack.c.h.bf16 %v4006_v63  ;;  %v1615_v52 = vadd.f32 %v1583_v45, %v1484_v44 }
 0x134   : > { %v1845_v51 = vmul.f32 %v4299_v8, %v3231_v23  ;;  %v3295_v20 = vunpack.c.l.bf16 %v4001_v39  ;;  %v3296_v7 = vunpack.c.h.bf16 %v4001_v39  ;;  %v2206_v53 = vmax.f32 %v2174_v55, 0.0 }
 0x135   : > { %v2207_v57 = vmax.f32 %v2175_v11, 0.0  ;;  %v1745_v26 = vadd.f32 %v1713_v30, %v1614_v17  ;;  %v1846_v18 = vmul.f32 %v4299_v8, %v3232_v34  ;;  %v1746_v61 = vadd.f32 %v1714_v14, %v1615_v52 }
 0x136   : > { %v1977_v10 = vmul.f32 %v4310_v54, %v3295_v20  ;;  %v1978_v33 = vmul.f32 %v4310_v54, %v3296_v7  ;;  %v3359_v15 = vunpack.c.l.bf16 %v4011_v60  ;;  %v3360_v24 = vunpack.c.h.bf16 %v4011_v60  ;;  %v4392_v60 = vld [vmem:[%s4818_s6] ss:$0 sm:$0xff] }
 0x137   : > { %v2231_v63 = vpack.c.bf16 %v2207_v57, %v2206_v53  ;;  %v1877_v59 = vadd.f32 %v1845_v51, %v1745_v26  ;;  %v513_v50 = vadd.f32 %v4123_v46, %v512_v6  ;;  %v1878_v13 = vadd.f32 %v1846_v18, %v1746_v61  ;;  %v517_v52 = vpop.f32.mrf.mxu3  ;;  %v3487_v18 = vld [vmem:[#allocation2 + $0x50] sm:$0xff]   ;;  %v3502_v61 = vld [vmem:[#allocation2 + $0xe0] sm:$0xff]  }
 0x138   : > { %v2109_v39 = vmul.f32 %v4319_v38, %v3359_v15  ;;  %v515_v27 = vadd.f32 %v4123_v46, %v514_v0  ;;  %v1060_v56 = vmul.f32 %v4209_v43, %v4286_v32  ;;  %v2110_v35 = vmul.f32 %v4319_v38, %v3360_v24 }
 0x139   : > { %2334 = vmatmul.bf16.gmra.mxu1 %v2231_v63  ;;  %v2009_v44 = vadd.f32 %v1977_v10, %v1877_v59  ;;  %v550_v21 = vmax.f32 %v513_v50, 0.0  ;;  %v1061_v9 = vmul.f32 %v4209_v43, %v4288_v62  ;;  %v2010_v45 = vadd.f32 %v1978_v33, %v1878_v13  ;;  %v4420_v59 = vld [vmem:[#allocation2 + $0x170] sm:$0xff]   ;;  %v3610_v50 = vld [vmem:[%s3714_s8] sm:$0xff] }
 0x13a   : > { %v551_v6 = vmax.f32 %v515_v27, 0.0  ;;  %v1191_v30 = vmul.f32 %v4239_v49, %v4290_v1  ;;  %v1192_v32 = vmul.f32 %v4239_v49, %v4292_v42  ;;  %v1322_v55 = vmul.f32 %v4249_v25, %v4294_v2 }
 0x13b   : > { %v2141_v14 = vadd.f32 %v2109_v39, %v2009_v44  ;;  %v661_v23 = vrot.slane %v550_v21, 7  ;;  %v790_v0 = vrot.slane %v550_v21, 1  ;;  %v2142_v62 = vadd.f32 %v2110_v35, %v2010_v45 }
 0x13c   : > { %v662_v11 = vrot.slane %v551_v6, 7  ;;  %v791_v17 = vrot.slane %v551_v6, 1  ;;  %v4400_v34 = vpack.c.bf16 %v551_v6, %v550_v21  ;;  %v1223_v42 = vadd.f32 %v1191_v30, %v1060_v56 }
 0x13d   : > { %v2176_v51 = vadd.f32 %v4368_v4, %v2141_v14  ;;  %v713_v1 = vsel %vm618_vm1, 0.0, %v661_v23  ;;  %v2300_v20 = vpop.f32.mrf.mxu1  ;;  %v1224_v7 = vadd.f32 %v1192_v32, %v1061_v9  ;;  %v2177_v53 = vadd.f32 %v4368_v4, %v2142_v62 }
 0x13e   : > { %v2301_v57 = vadd.f32 %v4392_v60, %v2300_v20  ;;  %v663_v2 = vsel %vm618_vm1, %v661_v23, %v662_v11  ;;  %v792_v26 = vsel %vm747_vm2, %v790_v0, %v791_v17  ;;  %v842_v33 = vsel %vm747_vm2, %v791_v17, 0.0 }
 0x13f   : > { %v2208_v10 = vmax.f32 %v2176_v51, 0.0  ;;  %v4416_v15 = vpack.c.bf16 %v663_v2, %v713_v1  ;;  %v1323_v63 = vmul.f32 %v4249_v25, %v4303_v58  ;;  %v2209_v24 = vmax.f32 %v2177_v53, 0.0 }
 0x140   : > { %v2380_v13 = vadd.f32 %v3610_v50, %v2301_v57  ;;  %v4423_v39 = vpack.c.bf16 %v842_v33, %v792_v26  ;;  %v1354_v27 = vadd.f32 %v1322_v55, %v1223_v42  ;;  %v3043_v44 = vunpack.c.l.bf16 %v3487_v18  ;;  %v519_v26 = vpop.f32.mrf.mxu3 }
 0x141   : > { %v1355_v56 = vadd.f32 %v1323_v63, %v1224_v7  ;;  %v3044_v35 = vunpack.c.h.bf16 %v3487_v18  ;;  %v3107_v21 = vunpack.c.l.bf16 %v3502_v61  ;;  %v2232_v9 = vpack.c.bf16 %v2209_v24, %v2208_v10  ;;  %v3611_v63 = vld [vmem:[%s3714_s8 + $0x8] sm:$0xff] }
 0x142   : > { %2412 = vst.msk [vmem:[%s4413_s16] sm:$0xff] %vm384_vm0, %v2380_v13  ;;  %v3108_v45 = vunpack.c.h.bf16 %v3502_v61  ;;  %v3171_v6 = vunpack.c.l.bf16 %v4420_v59  ;;  %v3172_v58 = vunpack.c.h.bf16 %v4420_v59  ;;  %v1453_v30 = vmul.f32 %v4258_v19, %v3043_v44 }
 0x143   : > { %v1454_v32 = vmul.f32 %v4258_v19, %v3044_v35  ;;  %v1584_v14 = vmul.f32 %v4271_v3, %v3107_v21  ;;  %v3235_v23 = vunpack.c.l.bf16 %v4064_v28  ;;  %2339 = vmatmul.bf16.vlgmr.msra.gmra.mxu2 %v2232_v9  ;;  %v3236_v11 = vunpack.c.h.bf16 %v4064_v28 }
 0x144   : > { %v1585_v0 = vmul.f32 %v4271_v3, %v3108_v45  ;;  %v1715_v55 = vmul.f32 %v4280_v37, %v3171_v6  ;;  %v1716_v62 = vmul.f32 %v4280_v37, %v3172_v58  ;;  %v1485_v51 = vadd.f32 %v1453_v30, %v1354_v27 }
 0x145   : > { %v2302_v17 = vpop.f32.mrf.mxu1  ;;  %v1486_v1 = vadd.f32 %v1454_v32, %v1355_v56  ;;  %v1847_v20 = vmul.f32 %v4299_v8, %v3235_v23  ;;  %v3299_v42 = vunpack.c.l.bf16 %v4059_v16  ;;  %v1848_v53 = vmul.f32 %v4299_v8, %v3236_v11 }
 0x146   : > { %v2303_v7 = vadd.f32 %v4392_v60, %v2302_v17  ;;  %v3300_v57 = vunpack.c.h.bf16 %v4059_v16  ;;  %v3363_v2 = vunpack.c.l.bf16 %v4069_v31  ;;  %v1616_v18 = vadd.f32 %v1584_v14, %v1485_v51 }
 0x147   : > { %v1617_v61 = vadd.f32 %v1585_v0, %v1486_v1  ;;  %v1979_v10 = vmul.f32 %v4310_v54, %v3299_v42  ;;  %v3364_v33 = vunpack.c.h.bf16 %v4069_v31  ;;  %v518_v27 = vadd.f32 %v4123_v46, %v517_v52 }
 0x148   : > { %v2381_v24 = vadd.f32 %v3611_v63, %v2303_v7  ;;  %v1980_v50 = vmul.f32 %v4310_v54, %v3300_v57  ;;  %v2111_v13 = vmul.f32 %v4319_v38, %v3363_v2  ;;  %v1747_v56 = vadd.f32 %v1715_v55, %v1616_v18 }
 0x149   : > { %v1748_v16 = vadd.f32 %v1716_v62, %v1617_v61  ;;  %v2112_v9 = vmul.f32 %v4319_v38, %v3364_v33  ;;  %v520_v30 = vadd.f32 %v4123_v46, %v519_v26  ;;  %v552_v32 = vmax.f32 %v518_v27, 0.0 }
 0x14a   : > { %2413 = vst.msk [vmem:[%s4413_s16 + $0x8] sm:$0xff] %vm384_vm0, %v2381_v24  ;;  %v1062_v14 = vmul.f32 %v4209_v43, %v3043_v44  ;;  %v1063_v31 = vmul.f32 %v4209_v43, %v3044_v35  ;;  %v1193_v0 = vmul.f32 %v4239_v49, %v3107_v21  ;;  %v1879_v17 = vadd.f32 %v1847_v20, %v1747_v56 }
 0x14b   : > { %v1880_v51 = vadd.f32 %v1848_v53, %v1748_v16  ;;  %v553_v1 = vmax.f32 %v520_v30, 0.0  ;;  %v1194_v52 = vmul.f32 %v4239_v49, %v3108_v45  ;;  %v664_v55 = vrot.slane %v552_v32, 7  ;;  %v3518_v16 = vld [vmem:[#allocation2 + $0x178] sm:$0xff]  }
 0x14c   : > { %v793_v62 = vrot.slane %v552_v32, 1  ;;  %v1225_v7 = vadd.f32 %v1193_v0, %v1062_v14  ;;  %v1324_v46 = vmul.f32 %v4249_v25, %v3171_v6  ;;  %v2011_v2 = vadd.f32 %v1979_v10, %v1879_v17  ;;  %v3612_v6 = vld [vmem:[%s3714_s8 + $0x10] sm:$0xff] }
 0x14d   : > { %v2012_v26 = vadd.f32 %v1980_v50, %v1880_v51  ;;  %v2305_v18 = vpop.f32.mrf.mxu1  ;;  %v665_v61 = vrot.slane %v553_v1, 7  ;;  %v794_v44 = vrot.slane %v553_v1, 1  ;;  %v714_v35 = vsel %vm618_vm1, 0.0, %v664_v55 }
 0x14e   : > { %v2306_v21 = vadd.f32 %v4392_v60, %v2305_v18  ;;  %v4466_v20 = vpack.c.bf16 %v553_v1, %v552_v32  ;;  %v1226_v53 = vadd.f32 %v1194_v52, %v1063_v31  ;;  %v2143_v45 = vadd.f32 %v2111_v13, %v2011_v2 }
 0x14f   : > { %v2144_v33 = vadd.f32 %v2112_v9, %v2012_v26  ;;  %v666_v63 = vsel %vm618_vm1, %v664_v55, %v665_v61  ;;  %v795_v24 = vsel %vm747_vm2, %v793_v62, %v794_v44  ;;  %v843_v50 = vsel %vm747_vm2, %v794_v44, 0.0  ;;  %v3444_v61 = vld [vmem:[#allocation2 + $0x58] sm:$0xff]  }
 0x150   : > { %v2382_v10 = vadd.f32 %v3612_v6, %v2306_v21  ;;  %v4472_v27 = vpack.c.bf16 %v666_v63, %v714_v35  ;;  %v1325_v56 = vmul.f32 %v4249_v25, %v3172_v58  ;;  %v2178_v30 = vadd.f32 %v4368_v4, %v2143_v45  ;;  %v3613_v45 = vld [vmem:[%s3714_s8 + $0x18] sm:$0xff] }
 0x151   : > { %v2179_v13 = vadd.f32 %v4368_v4, %v2144_v33  ;;  %v4479_v9 = vpack.c.bf16 %v843_v50, %v795_v24  ;;  %v1356_v32 = vadd.f32 %v1324_v46, %v1225_v7  ;;  %v1455_v31 = vmul.f32 %v4258_v19, %v3235_v23 }
 0x152   : > { %2414 = vst.msk [vmem:[%s4413_s16 + $0x10] sm:$0xff] %vm384_vm0, %v2382_v10  ;;  %v1357_v14 = vadd.f32 %v1325_v56, %v1226_v53  ;;  %v1456_v59 = vmul.f32 %v4258_v19, %v3236_v11  ;;  %v1586_v58 = vmul.f32 %v4271_v3, %v3299_v42  ;;  %v2210_v0 = vmax.f32 %v2178_v30, 0.0 }
 0x153   : > { %v2211_v17 = vmax.f32 %v2179_v13, 0.0  ;;  %v1587_v51 = vmul.f32 %v4271_v3, %v3300_v57  ;;  %v3175_v1 = vunpack.c.l.bf16 %v3518_v16  ;;  %v1487_v52 = vadd.f32 %v1455_v31, %v1356_v32 }
 0x154   : > { %v1488_v55 = vadd.f32 %v1456_v59, %v1357_v14  ;;  %v3176_v62 = vunpack.c.h.bf16 %v3518_v16  ;;  %v3239_v7 = vunpack.c.l.bf16 %v4154_v48  ;;  %v3240_v28 = vunpack.c.h.bf16 %v4154_v48  ;;  %v3459_v48 = vld [vmem:[#allocation2 + $0xe8] sm:$0xff]  }
 0x155   : > { %v2233_v46 = vpack.c.bf16 %v2211_v17, %v2210_v0  ;;  %v2307_v2 = vpop.f32.mrf.mxu1  ;;  %v1717_v23 = vmul.f32 %v4280_v37, %v3175_v1  ;;  %v3303_v11 = vunpack.c.l.bf16 %v4142_v22  ;;  %v1618_v26 = vadd.f32 %v1586_v58, %v1487_v52 }
 0x156   : > { %v2308_v42 = vadd.f32 %v4392_v60, %v2307_v2  ;;  %v1619_v18 = vadd.f32 %v1587_v51, %v1488_v55  ;;  %v1718_v57 = vmul.f32 %v4280_v37, %v3176_v62  ;;  %v1849_v44 = vmul.f32 %v4299_v8, %v3239_v7 }
 0x157   : > { %2344 = vmatmul.bf16.gmra.mxu2 %v2233_v46  ;;  %v1850_v35 = vmul.f32 %v4299_v8, %v3240_v28  ;;  %v3304_v21 = vunpack.c.h.bf16 %v4142_v22  ;;  %v1981_v53 = vmul.f32 %v4310_v54, %v3303_v11  ;;  %v1749_v63 = vadd.f32 %v1717_v23, %v1618_v26 }
 0x158   : > { %v2383_v33 = vadd.f32 %v3613_v45, %v2308_v42  ;;  %v1750_v24 = vadd.f32 %v1718_v57, %v1619_v18  ;;  %v3367_v6 = vunpack.c.l.bf16 %v4157_v47  ;;  %v3368_v50 = vunpack.c.h.bf16 %v4157_v47 }
 0x159   : > { %v1982_v10 = vmul.f32 %v4310_v54, %v3304_v21  ;;  %v2859_v56 = vunpack.c.l.bf16 %v3444_v61  ;;  %v2860_v16 = vunpack.c.h.bf16 %v3444_v61  ;;  %v1881_v30 = vadd.f32 %v1849_v44, %v1749_v63 }
 0x15a   : > { %2415 = vst.msk [vmem:[%s4413_s16 + $0x18] sm:$0xff] %vm384_vm0, %v2383_v33  ;;  %v1882_v13 = vadd.f32 %v1850_v35, %v1750_v24  ;;  %v2113_v22 = vmul.f32 %v4319_v38, %v3367_v6  ;;  %v2923_v32 = vunpack.c.l.bf16 %v3459_v48  ;;  %v2114_v14 = vmul.f32 %v4319_v38, %v3368_v50 }
 0x15b   : > { %v1064_v31 = vmul.f32 %v4209_v43, %v2859_v56  ;;  %v1065_v59 = vmul.f32 %v4209_v43, %v2860_v16  ;;  %v2924_v58 = vunpack.c.h.bf16 %v3459_v48  ;;  %v2013_v0 = vadd.f32 %v1981_v53, %v1881_v30  ;;  %v3445_v56 = vld [vmem:[#allocation2 + $0x60] sm:$0xff]  }
 0x15c   : > { %v2014_v17 = vadd.f32 %v1982_v10, %v1882_v13  ;;  %v1195_v47 = vmul.f32 %v4239_v49, %v2923_v32  ;;  %v1326_v51 = vmul.f32 %v4249_v25, %v3175_v1  ;;  %v1327_v46 = vmul.f32 %v4249_v25, %v3176_v62 }
 0x15d   : > { %v2310_v52 = vpop.f32.mrf.mxu1  ;;  %v1196_v55 = vmul.f32 %v4239_v49, %v2924_v58  ;;  %v1457_v2 = vmul.f32 %v4258_v19, %v3239_v7  ;;  %v1458_v23 = vmul.f32 %v4258_v19, %v3240_v28  ;;  %v2145_v42 = vadd.f32 %v2113_v22, %v2013_v0  ;;  %v3614_v7 = vld [vmem:[%s3714_s8 + $0x20] sm:$0xff] }
 0x15e   : > { %v2146_v26 = vadd.f32 %v2114_v14, %v2014_v17  ;;  %v2311_v18 = vadd.f32 %v4392_v60, %v2310_v52  ;;  %v1227_v57 = vadd.f32 %v1195_v47, %v1064_v31  ;;  %v1588_v44 = vmul.f32 %v4271_v3, %v3303_v11  ;;  %v3460_v31 = vld [vmem:[#allocation2 + $0xf0] sm:$0xff]  }
 0x15f   : > { %v1228_v61 = vadd.f32 %v1196_v55, %v1065_v59  ;;  %v1589_v1 = vmul.f32 %v4271_v3, %v3304_v21  ;;  %v1719_v35 = vmul.f32 %v4280_v37, %v3367_v6  ;;  %v2180_v53 = vadd.f32 %v4368_v4, %v2145_v42 }
 0x160   : > { %v2181_v62 = vadd.f32 %v4368_v4, %v2146_v26  ;;  %v2384_v48 = vadd.f32 %v3614_v7, %v2311_v18  ;;  %v1358_v28 = vadd.f32 %v1326_v51, %v1227_v57  ;;  %v1720_v33 = vmul.f32 %v4280_v37, %v3368_v50  ;;  %v3615_v18 = vld [vmem:[%s3714_s8 + $0x28] sm:$0xff] }
 0x161   : > { %v1359_v45 = vadd.f32 %v1327_v46, %v1228_v61  ;;  %v3243_v63 = vunpack.c.l.bf16 %v4230_v5  ;;  %v3244_v24 = vunpack.c.h.bf16 %v4230_v5  ;;  %v2212_v10 = vmax.f32 %v2180_v53, 0.0  ;;  %v3475_v46 = vld [vmem:[#allocation2 + $0x180] sm:$0xff]  }
 0x162   : > { %v2213_v11 = vmax.f32 %v2181_v62, 0.0  ;;  %2416 = vst.msk [vmem:[%s4413_s16 + $0x20] sm:$0xff] %vm384_vm0, %v2384_v48  ;;  %v1489_v21 = vadd.f32 %v1457_v2, %v1358_v28  ;;  %v3307_v6 = vunpack.c.l.bf16 %v4220_v41  ;;  %v3308_v22 = vunpack.c.h.bf16 %v4220_v41 }
 0x163   : > { %v1490_v16 = vadd.f32 %v1458_v23, %v1359_v45  ;;  %v1851_v30 = vmul.f32 %v4299_v8, %v3243_v63  ;;  %v1852_v13 = vmul.f32 %v4299_v8, %v3244_v24  ;;  %v3371_v5 = vunpack.c.l.bf16 %v4232_v40 }
 0x164   : > { %v2234_v50 = vpack.c.bf16 %v2213_v11, %v2212_v10  ;;  %v1620_v32 = vadd.f32 %v1588_v44, %v1489_v21  ;;  %v1983_v14 = vmul.f32 %v4310_v54, %v3307_v6  ;;  %v1984_v0 = vmul.f32 %v4310_v54, %v3308_v22 }
 0x165   : > { %v2312_v59 = vpop.f32.mrf.mxu1  ;;  %v1621_v58 = vadd.f32 %v1589_v1, %v1490_v16  ;;  %v3372_v17 = vunpack.c.h.bf16 %v4232_v40  ;;  %v2863_v47 = vunpack.c.l.bf16 %v3445_v56  ;;  %v2115_v41 = vmul.f32 %v4319_v38, %v3371_v5 }
 0x166   : > { %v2313_v51 = vadd.f32 %v4392_v60, %v2312_v59  ;;  %v1751_v52 = vadd.f32 %v1719_v35, %v1620_v32  ;;  %v2864_v55 = vunpack.c.h.bf16 %v3445_v56  ;;  %v2927_v26 = vunpack.c.l.bf16 %v3460_v31 }
 0x167   : > { %2349 = vmatmul.bf16.gmra.mxu2 %v2234_v50  ;;  %v1752_v2 = vadd.f32 %v1720_v33, %v1621_v58  ;;  %v2116_v23 = vmul.f32 %v4319_v38, %v3372_v17  ;;  %v1066_v42 = vmul.f32 %v4209_v43, %v2863_v47  ;;  %v2928_v44 = vunpack.c.h.bf16 %v3460_v31 }
 0x168   : > { %v2385_v57 = vadd.f32 %v3615_v18, %v2313_v51  ;;  %v1883_v61 = vadd.f32 %v1851_v30, %v1751_v52  ;;  %v1067_v40 = vmul.f32 %v4209_v43, %v2864_v55  ;;  %v1197_v35 = vmul.f32 %v4239_v49, %v2927_v26 }
 0x169   : > { %v1884_v1 = vadd.f32 %v1852_v13, %v1752_v2  ;;  %v2991_v53 = vunpack.c.l.bf16 %v3475_v46  ;;  %v2992_v62 = vunpack.c.h.bf16 %v3475_v46  ;;  %v1198_v48 = vmul.f32 %v4239_v49, %v2928_v44  ;;  %v3446_v46 = vld [vmem:[#allocation2 + $0x68] sm:$0xff]  }
 0x16a   : > { %2417 = vst.msk [vmem:[%s4413_s16 + $0x28] sm:$0xff] %vm384_vm0, %v2385_v57  ;;  %v2015_v7 = vadd.f32 %v1983_v14, %v1883_v61  ;;  %v1459_v28 = vmul.f32 %v4258_v19, %v3243_v63  ;;  %v1460_v45 = vmul.f32 %v4258_v19, %v3244_v24  ;;  %v1229_v10 = vadd.f32 %v1197_v35, %v1066_v42 }
 0x16b   : > { %v2016_v33 = vadd.f32 %v1984_v0, %v1884_v1  ;;  %v1328_v11 = vmul.f32 %v4249_v25, %v2991_v53  ;;  %v1329_v21 = vmul.f32 %v4249_v25, %v2992_v62  ;;  %v1230_v16 = vadd.f32 %v1198_v48, %v1067_v40  ;;  %v3461_v40 = vld [vmem:[#allocation2 + $0xf8] sm:$0xff]   ;;  %v3476_v53 = vld [vmem:[#allocation2 + $0x188] sm:$0xff]  }
 0x16c   : > { %v2147_v56 = vadd.f32 %v2115_v41, %v2015_v7  ;;  %v1590_v30 = vmul.f32 %v4271_v3, %v3307_v6  ;;  %v1591_v13 = vmul.f32 %v4271_v3, %v3308_v22  ;;  %v1721_v63 = vmul.f32 %v4280_v37, %v3371_v5 }
 0x16d   : > { %v2148_v50 = vadd.f32 %v2116_v23, %v2016_v33  ;;  %v2315_v32 = vpop.f32.mrf.mxu1  ;;  %v1360_v14 = vadd.f32 %v1328_v11, %v1229_v10  ;;  %v1722_v24 = vmul.f32 %v4280_v37, %v3372_v17  ;;  %v1361_v58 = vadd.f32 %v1329_v21, %v1230_v16  ;;  %v3616_v17 = vld [vmem:[%s3714_s8 + $0x30] sm:$0xff] }
 0x16e   : > { %v2182_v31 = vadd.f32 %v4368_v4, %v2147_v56  ;;  %v2316_v59 = vadd.f32 %v4392_v60, %v2315_v32  ;;  %v4558_v0 = vunpack.c.l.bf16 %v4352_v36  ;;  %v4562_v22 = vunpack.c.h.bf16 %v4352_v36 }
 0x16f   : > { %v2183_v6 = vadd.f32 %v4368_v4, %v2148_v50  ;;  %v1491_v47 = vadd.f32 %v1459_v28, %v1360_v14  ;;  %v4565_v51 = vunpack.c.l.bf16 %v4341_v29  ;;  %v1492_v41 = vadd.f32 %v1460_v45, %v1361_v58 }
 0x170   : > { %v2214_v5 = vmax.f32 %v2182_v31, 0.0  ;;  %v2386_v52 = vadd.f32 %v3616_v17, %v2316_v59  ;;  %v1853_v55 = vmul.f32 %v4299_v8, %v4558_v0  ;;  %v1854_v42 = vmul.f32 %v4299_v8, %v4562_v22 }
 0x171   : > { %v2215_v2 = vmax.f32 %v2183_v6, 0.0  ;;  %v1622_v23 = vadd.f32 %v1590_v30, %v1491_v47  ;;  %v4573_v26 = vunpack.c.h.bf16 %v4341_v29  ;;  %v1623_v36 = vadd.f32 %v1591_v13, %v1492_v41 }
 0x172   : > { %2418 = vst.msk [vmem:[%s4413_s16 + $0x30] sm:$0xff] %vm384_vm0, %v2386_v52  ;;  %v1985_v18 = vmul.f32 %v4310_v54, %v4565_v51  ;;  %v4580_v57 = vunpack.c.l.bf16 %v4354_v12  ;;  %v4583_v61 = vunpack.c.h.bf16 %v4354_v12  ;;  %v2867_v29 = vunpack.c.l.bf16 %v3446_v46 }
 0x173   : > { %v2235_v44 = vpack.c.bf16 %v2215_v2, %v2214_v5  ;;  %v1753_v1 = vadd.f32 %v1721_v63, %v1622_v23  ;;  %v1986_v35 = vmul.f32 %v4310_v54, %v4573_v26  ;;  %v1754_v62 = vadd.f32 %v1722_v24, %v1623_v36  ;;  %v3617_v63 = vld [vmem:[%s3714_s8 + $0x38] sm:$0xff] }
 0x174   : > { %v2117_v7 = vmul.f32 %v4319_v38, %v4580_v57  ;;  %v2118_v48 = vmul.f32 %v4319_v38, %v4583_v61  ;;  %v2868_v28 = vunpack.c.h.bf16 %v3446_v46  ;;  %v1068_v33 = vmul.f32 %v4209_v43, %v2867_v29 }
 0x175   : > { %v2317_v45 = vpop.f32.mrf.mxu1  ;;  %v1885_v12 = vadd.f32 %v1853_v55, %v1753_v1  ;;  %v2931_v10 = vunpack.c.l.bf16 %v3461_v40  ;;  %v2932_v11 = vunpack.c.h.bf16 %v3461_v40  ;;  %v1886_v56 = vadd.f32 %v1854_v42, %v1754_v62 }
 0x176   : > { %v2318_v21 = vadd.f32 %v4392_v60, %v2317_v45  ;;  %v1069_v16 = vmul.f32 %v4209_v43, %v2868_v28  ;;  %v2995_v30 = vunpack.c.l.bf16 %v3476_v53  ;;  %v2996_v14 = vunpack.c.h.bf16 %v3476_v53 }
 0x177   : > { %2354 = vmatmul.bf16.gmra.mxu2 %v2235_v44  ;;  %v2017_v13 = vadd.f32 %v1985_v18, %v1885_v12  ;;  %v1199_v50 = vmul.f32 %v4239_v49, %v2931_v10  ;;  %v1200_v32 = vmul.f32 %v4239_v49, %v2932_v11  ;;  %v2018_v31 = vadd.f32 %v1986_v35, %v1886_v56  ;;  %v3618_v56 = vld [vmem:[%s3714_s8 + $0x40] sm:$0xff] }
 0x178   : > { %v2387_v24 = vadd.f32 %v3617_v63, %v2318_v21  ;;  %v1330_v59 = vmul.f32 %v4249_v25, %v2995_v30  ;;  %v1461_v58 = vmul.f32 %v4258_v19, %v4558_v0  ;;  %v1331_v17 = vmul.f32 %v4249_v25, %v2996_v14 }
 0x179   : > { %v2149_v6 = vadd.f32 %v2117_v7, %v2017_v13  ;;  %v1231_v47 = vadd.f32 %v1199_v50, %v1068_v33  ;;  %v1232_v5 = vadd.f32 %v1200_v32, %v1069_v16  ;;  %v2150_v52 = vadd.f32 %v2118_v48, %v2018_v31 }
 0x17a   : > { %2419 = vst.msk [vmem:[%s4413_s16 + $0x38] sm:$0xff] %vm384_vm0, %v2387_v24  ;;  %v1462_v41 = vmul.f32 %v4258_v19, %v4562_v22  ;;  %v1592_v55 = vmul.f32 %v4271_v3, %v4565_v51  ;;  %v1593_v46 = vmul.f32 %v4271_v3, %v4573_v26  ;;  %v1723_v36 = vmul.f32 %v4280_v37, %v4580_v57 }
 0x17b   : > { %v2184_v2 = vadd.f32 %v4368_v4, %v2149_v6  ;;  %v1362_v23 = vadd.f32 %v1330_v59, %v1231_v47  ;;  %v1363_v42 = vadd.f32 %v1331_v17, %v1232_v5  ;;  %v2185_v18 = vadd.f32 %v4368_v4, %v2150_v52 }
 0x17c   : > { %v1724_v40 = vmul.f32 %v4280_v37, %v4583_v61  ;;  %v4616_v44 = vunpack.c.l.bf16 %v4416_v15  ;;  %v4619_v1 = vunpack.c.h.bf16 %v4416_v15  ;;  %v4622_v7 = vunpack.c.l.bf16 %v4400_v34 }
 0x17d   : > { %v2216_v35 = vmax.f32 %v2184_v2, 0.0  ;;  %v2320_v29 = vpop.f32.mrf.mxu1  ;;  %v1493_v53 = vadd.f32 %v1461_v58, %v1362_v23  ;;  %v1494_v62 = vadd.f32 %v1462_v41, %v1363_v42  ;;  %v2217_v48 = vmax.f32 %v2185_v18, 0.0  ;;  %v3619_v18 = vld [vmem:[%s3714_s8 + $0x48] sm:$0xff] }
 0x17e   : > { %v2321_v28 = vadd.f32 %v4392_v60, %v2320_v29  ;;  %v1855_v45 = vmul.f32 %v4299_v8, %v4616_v44  ;;  %v1856_v12 = vmul.f32 %v4299_v8, %v4619_v1  ;;  %v4630_v10 = vunpack.c.h.bf16 %v4400_v34 }
 0x17f   : > { %v1624_v33 = vadd.f32 %v1592_v55, %v1493_v53  ;;  %v1625_v15 = vadd.f32 %v1593_v46, %v1494_v62  ;;  %v1987_v11 = vmul.f32 %v4310_v54, %v4622_v7  ;;  %v2236_v21 = vpack.c.bf16 %v2217_v48, %v2216_v35 }
 0x180   : > { %v2388_v16 = vadd.f32 %v3618_v56, %v2321_v28  ;;  %v4636_v30 = vunpack.c.l.bf16 %v4423_v39  ;;  %v4639_v13 = vunpack.c.h.bf16 %v4423_v39  ;;  %v1988_v14 = vmul.f32 %v4310_v54, %v4630_v10 }
 0x181   : > { %v1755_v50 = vadd.f32 %v1723_v36, %v1624_v33  ;;  %v1756_v32 = vadd.f32 %v1724_v40, %v1625_v15  ;;  %v1070_v34 = vmul.f32 %v4209_v43, %v4558_v0  ;;  %v1071_v39 = vmul.f32 %v4209_v43, %v4562_v22 }
 0x182   : > { %2420 = vst.msk [vmem:[%s4413_s16 + $0x40] sm:$0xff] %vm384_vm0, %v2388_v16  ;;  %v2119_v63 = vmul.f32 %v4319_v38, %v4636_v30  ;;  %v2120_v24 = vmul.f32 %v4319_v38, %v4639_v13  ;;  %v1201_v31 = vmul.f32 %v4239_v49, %v4565_v51  ;;  %v1202_v6 = vmul.f32 %v4239_v49, %v4573_v26 }
 0x183   : > { %v1887_v59 = vadd.f32 %v1855_v45, %v1755_v50  ;;  %v1888_v58 = vadd.f32 %v1856_v12, %v1756_v32  ;;  %v1332_v0 = vmul.f32 %v4249_v25, %v4580_v57  ;;  %v1333_v5 = vmul.f32 %v4249_v25, %v4583_v61 }
 0x184   : > { %v1233_v47 = vadd.f32 %v1201_v31, %v1070_v34  ;;  %v1463_v17 = vmul.f32 %v4258_v19, %v4616_v44  ;;  %v1464_v43 = vmul.f32 %v4258_v19, %v4619_v1  ;;  %v1234_v41 = vadd.f32 %v1202_v6, %v1071_v39  ;;  %v3620_v39 = vld [vmem:[%s4815_s3] ss:$0 sm:$0xff] }
 0x185   : > { %v2322_v22 = vpop.f32.mrf.mxu1  ;;  %v2019_v51 = vadd.f32 %v1987_v11, %v1887_v59  ;;  %v2020_v52 = vadd.f32 %v1988_v14, %v1888_v58  ;;  %v1594_v26 = vmul.f32 %v4271_v3, %v4622_v7  ;;  %v1595_v61 = vmul.f32 %v4271_v3, %v4630_v10 }
 0x186   : > { %v2323_v57 = vadd.f32 %v4392_v60, %v2322_v22  ;;  %v1364_v55 = vadd.f32 %v1332_v0, %v1233_v47  ;;  %v1725_v46 = vmul.f32 %v4280_v37, %v4636_v30  ;;  %v1365_v42 = vadd.f32 %v1333_v5, %v1234_v41 }
 0x187   : > { %2359 = vmatmul.bf16.gmra.mxu2 %v2236_v21  ;;  %v2151_v2 = vadd.f32 %v2119_v63, %v2019_v51  ;;  %v2152_v23 = vadd.f32 %v2120_v24, %v2020_v52  ;;  %v1726_v36 = vmul.f32 %v4280_v37, %v4639_v13  ;;  %v3255_v29 = vunpack.c.l.bf16 %v4472_v27 }
 0x188   : > { %v2389_v40 = vadd.f32 %v3619_v18, %v2323_v57  ;;  %v1495_v35 = vadd.f32 %v1463_v17, %v1364_v55  ;;  %v3256_v53 = vunpack.c.h.bf16 %v4472_v27  ;;  %v1496_v28 = vadd.f32 %v1464_v43, %v1365_v42 }
 0x189   : > { %v2186_v62 = vadd.f32 %v4368_v4, %v2151_v2  ;;  %v2187_v48 = vadd.f32 %v4368_v4, %v2152_v23  ;;  %v3319_v45 = vunpack.c.l.bf16 %v4466_v20  ;;  %v1857_v33 = vmul.f32 %v4299_v8, %v3255_v29 }
 0x18a   : > { %2421 = vst.msk [vmem:[%s4413_s16 + $0x48] sm:$0xff] %vm384_vm0, %v2389_v40  ;;  %v1626_v12 = vadd.f32 %v1594_v26, %v1495_v35  ;;  %v1858_v15 = vmul.f32 %v4299_v8, %v3256_v53  ;;  %v3320_v11 = vunpack.c.h.bf16 %v4466_v20  ;;  %v1627_v16 = vadd.f32 %v1595_v61, %v1496_v28 }
 0x18b   : > { %v2218_v21 = vmax.f32 %v2186_v62, 0.0  ;;  %v2219_v56 = vmax.f32 %v2187_v48, 0.0  ;;  %v1989_v27 = vmul.f32 %v4310_v54, %v3319_v45  ;;  %v3383_v14 = vunpack.c.l.bf16 %v4479_v9 }
 0x18c   : > { %v1757_v50 = vadd.f32 %v1725_v46, %v1626_v12  ;;  %v1990_v32 = vmul.f32 %v4310_v54, %v3320_v11  ;;  %v3384_v34 = vunpack.c.h.bf16 %v4479_v9  ;;  %v1758_v24 = vadd.f32 %v1726_v36, %v1627_v16 }
 0x18d   : > { %v2237_v63 = vpack.c.bf16 %v2219_v56, %v2218_v21  ;;  %v1072_v20 = vmul.f32 %v3620_v39, %v4616_v44  ;;  %v1073_v31 = vmul.f32 %v3620_v39, %v4619_v1  ;;  %v2121_v58 = vmul.f32 %v4319_v38, %v3383_v14 }
 0x18e   : > { %v1889_v59 = vadd.f32 %v1857_v33, %v1757_v50  ;;  %v2122_v6 = vmul.f32 %v4319_v38, %v3384_v34  ;;  %v1203_v0 = vmul.f32 %v4239_v49, %v4622_v7  ;;  %v1890_v47 = vadd.f32 %v1858_v15, %v1758_v24  ;;  %v3622_v50 = vld [vmem:[%s4815_s3 + $0x7] ss:$0 sm:$0xff] }
 0x18f   : > { %v2325_v9 = vpop.f32.mrf.mxu1  ;;  %v1204_v5 = vmul.f32 %v4239_v49, %v4630_v10  ;;  %v1334_v17 = vmul.f32 %v4249_v25, %v4636_v30  ;;  %v1335_v44 = vmul.f32 %v4249_v25, %v4639_v13  ;;  %v1465_v38 = vmul.f32 %v4258_v19, %v3255_v29  ;;  %v3538_v49 = vld [vmem:[#allocation2 + $0x88] sm:$0xff]   ;;  %v3621_v10 = vld [vmem:[%s3714_s8 + $0x50] sm:$0xff]  ;;  %v3553_v13 = vld [vmem:[#allocation2 + $0x118] sm:$0xff]  }
 0x190   : > { %v2326_v1 = vadd.f32 %v4392_v60, %v2325_v9  ;;  %v2021_v43 = vadd.f32 %v1989_v27, %v1889_v59  ;;  %v1235_v22 = vadd.f32 %v1203_v0, %v1072_v20  ;;  %v2022_v51 = vadd.f32 %v1990_v32, %v1890_v47 }
 0x191   : > { %v1236_v7 = vadd.f32 %v1204_v5, %v1073_v31  ;;  %v1466_v52 = vmul.f32 %v4258_v19, %v3256_v53  ;;  %v1596_v41 = vmul.f32 %v4271_v3, %v3319_v45  ;;  %v1597_v25 = vmul.f32 %v4271_v3, %v3320_v11  ;;  %v3568_v3 = vld [vmem:[#allocation2 + $0x1a8] sm:$0xff]  }
 0x192   : > { %v2390_v26 = vadd.f32 %v3621_v10, %v2326_v1  ;;  %v2153_v30 = vadd.f32 %v2121_v58, %v2021_v43  ;;  %v1366_v57 = vadd.f32 %v1334_v17, %v1235_v22  ;;  %v2154_v55 = vadd.f32 %v2122_v6, %v2022_v51  ;;  %v3625_v1 = vld [vmem:[%s3714_s8 + $0x60] sm:$0xff]  ;;  %v3626_v51 = vld [vmem:[%s3714_s8 + $0x68] sm:$0xff] }
 0x193   : > { %v1367_v61 = vadd.f32 %v1335_v44, %v1236_v7  ;;  %v1727_v46 = vmul.f32 %v4280_v37, %v3383_v14  ;;  %v1728_v2 = vmul.f32 %v4280_v37, %v3384_v34  ;;  %v3259_v42 = vunpack.c.l.bf16 %v3538_v49  ;;  %v3623_v14 = vld [vmem:[%s3714_s8 + $0x58] sm:$0xff] }
 0x194   : > { %2422 = vst.msk [vmem:[%s4413_s16 + $0x50] sm:$0xff] %vm384_vm0, %v2390_v26  ;;  %v2188_v19 = vadd.f32 %v4368_v4, %v2153_v30  ;;  %v1497_v23 = vadd.f32 %v1465_v38, %v1366_v57  ;;  %v3260_v36 = vunpack.c.h.bf16 %v3538_v49  ;;  %v2189_v18 = vadd.f32 %v4368_v4, %v2154_v55  ;;  %v3628_v30 = vld [vmem:[%s3714_s8 + $0x78] sm:$0xff]  ;;  %v3629_v55 = vld [vmem:[%s3714_s8 + $0x80] sm:$0xff] }
 0x195   : > { %v1498_v40 = vadd.f32 %v1466_v52, %v1367_v61  ;;  %v3323_v35 = vunpack.c.l.bf16 %v3553_v13  ;;  %v3324_v29 = vunpack.c.h.bf16 %v3553_v13  ;;  %v1859_v48 = vmul.f32 %v4299_v8, %v3259_v42 }
 0x196   : > { %v2220_v53 = vmax.f32 %v2188_v19, 0.0  ;;  %v1628_v62 = vadd.f32 %v1596_v41, %v1497_v23  ;;  %v2221_v28 = vmax.f32 %v2189_v18, 0.0  ;;  %v1860_v12 = vmul.f32 %v4299_v8, %v3260_v36  ;;  %v3624_v8 = vld [vmem:[%s4815_s3 + $0x8] ss:$0 sm:$0xff]  ;;  %v3627_v41 = vld [vmem:[%s3714_s8 + $0x70] sm:$0xff] }
 0x197   : > { %2364 = vmatmul.bf16.gmra.mxu2 %v2237_v63  ;;  %v2327_v37 = vpop.f32.mrf.mxu1  ;;  %v1629_v45 = vadd.f32 %v1597_v25, %v1498_v40  ;;  %v1991_v33 = vmul.f32 %v4310_v54, %v3323_v35  ;;  %v3387_v21 = vunpack.c.l.bf16 %v3568_v3  ;;  %v3388_v56 = vunpack.c.h.bf16 %v3568_v3  ;;  %v3630_v19 = vld [vmem:[%s3714_s8 + $0x88] sm:$0xff]  ;;  %v3631_v18 = vld [vmem:[%s3714_s8 + $0x90] sm:$0xff]  ;;  %v3632_v3 = vld [vmem:[%s3714_s8 + $0x98] sm:$0xff] }
 0x198   : > { %v2328_v15 = vadd.f32 %v4392_v60, %v2327_v37  ;;  %v1759_v11 = vadd.f32 %v1727_v46, %v1628_v62  ;;  %v2238_v16 = vpack.c.bf16 %v2221_v28, %v2220_v53  ;;  %v1992_v32 = vmul.f32 %v3622_v50, %v3324_v29  ;;  %v3633_v37 = vld [vmem:[%s3714_s8 + $0xa0] sm:$0xff] }
 0x199   : > { %v1760_v27 = vadd.f32 %v1728_v2, %v1629_v45  ;;  %v2123_v54 = vmul.f32 %v3624_v8, %v3387_v21  ;;  %v2124_v39 = vmul.f32 %v3624_v8, %v3388_v56  ;;  %v3635_v56 = vld [vmem:[%s3714_s8 + $0xb0] sm:$0xff]  ;;  %v3637_v8 = vld [vmem:[%s3714_s8 + $0xc0] sm:$0xff] }
 0x19a   : > { %v2391_v34 = vadd.f32 %v3623_v14, %v2328_v15  ;;  %v1891_v63 = vadd.f32 %v1859_v48, %v1759_v11 }
 0x19b   : > { %v1892_v24 = vadd.f32 %v1860_v12, %v1760_v27 }
 0x19c   : > { %2423 = vst.msk [vmem:[%s4413_s16 + $0x58] sm:$0xff] %vm384_vm0, %v2391_v34  ;;  %v2023_v20 = vadd.f32 %v1991_v33, %v1891_v63  ;;  %v3634_v33 = vld [vmem:[%s3714_s8 + $0xa8] sm:$0xff] }
 0x19d   : > { %v2024_v31 = vadd.f32 %v1992_v32, %v1892_v24  ;;  %v3636_v32 = vld [vmem:[%s3714_s8 + $0xb8] sm:$0xff] }
 0x19e   : > { %v2155_v59 = vadd.f32 %v2123_v54, %v2023_v20  ;;  %v3638_v20 = vld [vmem:[%s3714_s8 + $0xc8] sm:$0xff] }
 0x19f   : > { %v2156_v58 = vadd.f32 %v2124_v39, %v2024_v31 }
 0x1a0   : > { %v2190_v6 = vadd.f32 %v4368_v4, %v2155_v59 }
 0x1a1   : > { %v2191_v0 = vadd.f32 %v4368_v4, %v2156_v58 }
 0x1a2   : > { %v2222_v9 = vmax.f32 %v2190_v6, 0.0  ;;  %v2330_v47 = vpop.f32.mrf.mxu1  ;;  %v3639_v6 = vld [vmem:[%s3714_s8 + $0xd0] sm:$0xff] }
 0x1a3   : > { %v2223_v5 = vmax.f32 %v2191_v0, 0.0  ;;  %v2331_v17 = vadd.f32 %v4392_v60, %v2330_v47  ;;  %v3640_v47 = vld [vmem:[%s4818_s6] ss:$0 sm:$0xff] }
 0x1a5   : > { %v2239_v44 = vpack.c.bf16 %v2223_v5, %v2222_v9  ;;  %v2392_v43 = vadd.f32 %v3625_v1, %v2331_v17  ;;  %v3641_v17 = vld [vmem:[%s3714_s8 + $0xd8] sm:$0xff] }
 0x1a7   : > { %2369 = vmatmul.bf16.gmra.mxu2 %v2238_v16  ;;  %2424 = vst.msk [vmem:[%s4413_s16 + $0x60] sm:$0xff] %vm384_vm0, %v2392_v43  ;;  %v3642_v43 = vld [vmem:[%s3714_s8 + $0xe0] sm:$0xff] }
 0x1aa   : > { %v2332_v22 = vpop.f32.mrf.mxu1 }
 0x1ab   : > { %v2333_v38 = vadd.f32 %v4392_v60, %v2332_v22 }
 0x1ad   : > { %v2393_v4 = vadd.f32 %v3626_v51, %v2333_v38 }
 0x1af   : > { %2425 = vst.msk [vmem:[%s4413_s16 + $0x68] sm:$0xff] %vm384_vm0, %v2393_v4  ;;  %v3643_v4 = vld [vmem:[%s3714_s8 + $0xe8] sm:$0xff] }
 0x1b6   : > { %v2335_v7 = vpop.f32.mrf.mxu1 }
 0x1b7   : > { %2374 = vmatmul.bf16.gmra.mxu2 %v2239_v44  ;;  %v2336_v52 = vadd.f32 %v4392_v60, %v2335_v7 }
 0x1b9   : > { %v2394_v49 = vadd.f32 %v3627_v41, %v2336_v52 }
 0x1bb   : > { %2426 = vst.msk [vmem:[%s4413_s16 + $0x70] sm:$0xff] %vm384_vm0, %v2394_v49  ;;  %v3644_v49 = vld [vmem:[%s3714_s8 + $0xf0] sm:$0xff] }
 0x1be   : > { %v2337_v10 = vpop.f32.mrf.mxu1 }
 0x1bf   : > { %v2338_v26 = vadd.f32 %v4392_v60, %v2337_v10 }
 0x1c1   : > { %v2395_v57 = vadd.f32 %v3628_v30, %v2338_v26 }
 0x1c3   : > { %2427 = vst.msk [vmem:[%s4413_s16 + $0x78] sm:$0xff] %vm384_vm0, %v2395_v57  ;;  %v3645_v57 = vld [vmem:[%s3714_s8 + $0xf8] sm:$0xff] }
 0x1c6   : > { %v2340_v25 = vpop.f32.mrf.mxu2 }
 0x1c7   : > { %v2341_v13 = vadd.f32 %v4392_v60, %v2340_v25 }
 0x1c9   : > { %v2396_v61 = vadd.f32 %v3629_v55, %v2341_v13 }
 0x1cb   : > { %2428 = vst.msk [vmem:[%s4413_s16 + $0x80] sm:$0xff] %vm384_vm0, %v2396_v61 }
 0x1ce   : > { %v2342_v46 = vpop.f32.mrf.mxu2 }
 0x1cf   : > { %v2343_v2 = vadd.f32 %v4392_v60, %v2342_v46 }
 0x1d1   : > { %v2397_v23 = vadd.f32 %v3630_v19, %v2343_v2 }
 0x1d3   : > { %2429 = vst.msk [vmem:[%s4413_s16 + $0x88] sm:$0xff] %vm384_vm0, %v2397_v23 }
 0x1da   : > { %v2345_v42 = vpop.f32.mrf.mxu2 }
 0x1db   : > { %v2346_v36 = vadd.f32 %v4392_v60, %v2345_v42 }
 0x1dd   : > { %v2398_v40 = vadd.f32 %v3631_v18, %v2346_v36 }
 0x1df   : > { %2430 = vst.msk [vmem:[%s4413_s16 + $0x90] sm:$0xff] %vm384_vm0, %v2398_v40 }
 0x1e2   : > { %v2347_v35 = vpop.f32.mrf.mxu2 }
 0x1e3   : > { %v2348_v29 = vadd.f32 %v4392_v60, %v2347_v35 }
 0x1e5   : > { %v2399_v53 = vadd.f32 %v3632_v3, %v2348_v29 }
 0x1e7   : > { %2431 = vst.msk [vmem:[%s4413_s16 + $0x98] sm:$0xff] %vm384_vm0, %v2399_v53 }
 0x1ea   : > { %v2350_v62 = vpop.f32.mrf.mxu2 }
 0x1eb   : > { %v2351_v48 = vadd.f32 %v4392_v60, %v2350_v62 }
 0x1ed   : > { %v2400_v28 = vadd.f32 %v3633_v37, %v2351_v48 }
 0x1ef   : > { %2432 = vst.msk [vmem:[%s4413_s16 + $0xa0] sm:$0xff] %vm384_vm0, %v2400_v28 }
 0x1f2   : > { %v2352_v45 = vpop.f32.mrf.mxu2 }
 0x1f3   : > { %v2353_v12 = vadd.f32 %v4392_v60, %v2352_v45 }
 0x1f5   : > { %v2401_v15 = vadd.f32 %v3634_v33, %v2353_v12 }
 0x1f7   : > { %2433 = vst.msk [vmem:[%s4413_s16 + $0xa8] sm:$0xff] %vm384_vm0, %v2401_v15 }
 0x1fa   : > { %v2355_v11 = vpop.f32.mrf.mxu2 }
 0x1fb   : > { %v2356_v21 = vadd.f32 %v4392_v60, %v2355_v11 }
 0x1fd   : > { %v2402_v16 = vadd.f32 %v3635_v56, %v2356_v21 }
 0x1ff   : > { %2434 = vst.msk [vmem:[%s4413_s16 + $0xb0] sm:$0xff] %vm384_vm0, %v2402_v16 }
 0x202   : > { %v2357_v27 = vpop.f32.mrf.mxu2 }
 0x203   : > { %v2358_v50 = vadd.f32 %v4392_v60, %v2357_v27 }
 0x205   : > { %v2403_v14 = vadd.f32 %v3636_v32, %v2358_v50 }
 0x207   : > { %2435 = vst.msk [vmem:[%s4413_s16 + $0xb8] sm:$0xff] %vm384_vm0, %v2403_v14 }
 0x20a   : > { %v2360_v34 = vpop.f32.mrf.mxu2 }
 0x20b   : > { %v2361_v63 = vadd.f32 %v4392_v60, %v2360_v34 }
 0x20d   : > { %v2404_v54 = vadd.f32 %v3637_v8, %v2361_v63 }
 0x20f   : > { %2436 = vst.msk [vmem:[%s4413_s16 + $0xc0] sm:$0xff] %vm384_vm0, %v2404_v54 }
 0x212   : > { %v2362_v24 = vpop.f32.mrf.mxu2 }
 0x213   : > { %v2363_v39 = vadd.f32 %v4392_v60, %v2362_v24 }
 0x215   : > { %v2405_v31 = vadd.f32 %v3638_v20, %v2363_v39 }
 0x217   : > { %2437 = vst.msk [vmem:[%s4413_s16 + $0xc8] sm:$0xff] %vm384_vm0, %v2405_v31 }
 0x21a   : > { %v2365_v59 = vpop.f32.mrf.mxu2 }
 0x21b   : > { %v2366_v58 = vadd.f32 %v4392_v60, %v2365_v59 }
 0x21d   : > { %v2406_v0 = vadd.f32 %v3639_v6, %v2366_v58 }
 0x21f   : > { %2438 = vst.msk [vmem:[%s4413_s16 + $0xd0] sm:$0xff] %vm384_vm0, %v2406_v0 }
 0x222   : > { %v2367_v9 = vpop.f32.mrf.mxu2 }
 0x223   : > { %v2368_v5 = vadd.f32 %v3640_v47, %v2367_v9 }
 0x225   : > { %v2407_v44 = vadd.f32 %v3641_v17, %v2368_v5 }
 0x227   : > { %2439 = vst.msk [vmem:[%s4413_s16 + $0xd8] sm:$0xff] %vm384_vm0, %v2407_v44 }
 0x22a   : > { %v2370_v1 = vpop.f32.mrf.mxu2 }
 0x22b   : > { %v2371_v60 = vadd.f32 %v3640_v47, %v2370_v1 }
 0x22d   : > { %v2408_v22 = vadd.f32 %v3642_v43, %v2371_v60 }
 0x22f   : > { %2440 = vst.msk [vmem:[%s4413_s16 + $0xe0] sm:$0xff] %vm384_vm0, %v2408_v22 }
 0x232   : > { %v2372_v38 = vpop.f32.mrf.mxu2 }
 0x233   : > { %v2373_v51 = vadd.f32 %v3640_v47, %v2372_v38 }
 0x235   : > { %v2409_v7 = vadd.f32 %v3643_v4, %v2373_v51 }
 0x237   : > { %2441 = vst.msk [vmem:[%s4413_s16 + $0xe8] sm:$0xff] %vm384_vm0, %v2409_v7 }
 0x23a   : > { %v2375_v52 = vpop.f32.mrf.mxu2 }
 0x23b   : > { %v2376_v41 = vadd.f32 %v3640_v47, %v2375_v52 }
 0x23d   : > { %v2410_v10 = vadd.f32 %v3644_v49, %v2376_v41 }
 0x23f   : > { %2442 = vst.msk [vmem:[%s4413_s16 + $0xf0] sm:$0xff] %vm384_vm0, %v2410_v10 }
 0x242   : > { %v2377_v26 = vpop.f32.mrf.mxu2 }
 0x243   : > { %v2378_v30 = vadd.f32 %v3640_v47, %v2377_v26 }
 0x245   : > { %v2411_v25 = vadd.f32 %v3645_v57, %v2378_v30 }
 0x247   : > { %2443 = vst.msk [vmem:[%s4413_s16 + $0xf8] sm:$0xff] %vm384_vm0, %v2411_v25 }
 0x248 PF: > { %s17_s24 = sadd.s32 1, %s3652_s24  }
 0x249   : > { %p14_p4 = scmp.ge.s32.totalorder %s17_s24, 4  }
 0x24b   :  { %16 = sbr.rel (!%p14_p4) target bundleno = 1 (0x1), region = 89 }

</bundles_post_ra>
